<compile_context>
chip_gen: v7x
topology: tpu7x:2x2x1
jax: 0.10.0
libtpu: 0.0.40
codegen_flags: <defaults>
</compile_context>

<pallas_src>
import jax
import jax.numpy as jnp
from jax import lax
from jax.experimental import pallas as pl
from jax.experimental.pallas import tpu as pltpu

LANE = 128
SUBLANE = 8


def _round_up(n, m):
    return ((n + m - 1) // m) * m


def _gelu(x):
    # tanh-approximate GELU: goes to the EUP slot (otherwise idle) instead of a
    # long erf polynomial on the VALU.  ~1e-3 rel. delta vs torch's exact erf.
    return jax.nn.gelu(x, approximate=True)


def _roll_rows(v, shift, size):
    """Rotate rows (sublane axis) of a 2-D value by a static shift (with wrap)."""
    s = shift % size
    if s == 0:
        return v
    return pltpu.roll(v, shift=s, axis=0)


# --------------------------------------------------------------------------
# Fused kernel: input_fc + time_emb + mask, then all ConvBlocks, VMEM-resident.
#
# Dilated SamePadConv (k=3, dilation d, padding d):
#   y[t] = b + x[t-d] @ W[0] + x[t] @ W[1] + x[t+d] @ W[2]   (out-of-range -> 0)
# implemented as three accumulated MXU dots; the shifted operands come from
# pltpu.roll (XLU sublane rotate) + (M,1) validity masks.  Rows of the block
# from different batch sequences / T-padding never leak into each other because
# the masks are built from the true per-sequence time index and true T.
# --------------------------------------------------------------------------
def _make_fused_kernel(BB, Tp, T_true, Cin, Cp, Cpo, block_cfg):
    M = BB * Tp
    dils = sorted({d for d, _ in block_cfg})

    def kernel(x_ref, te_ref, m_ref, t_ref, w_in_ref, b_in_ref,
               w1_ref, b1_ref, w2_ref, b2_ref, wp_ref, bp_ref, o_ref):
        # ---- input projection + time embedding + mask ----
        x = x_ref[...].reshape(M, Cin)                               # bf16
        h = jnp.dot(x, w_in_ref[...], preferred_element_type=jnp.float32)
        te = te_ref[...].reshape(M, Cp).astype(jnp.float32)
        msk = m_ref[...].reshape(M, 1)
        h = (h + b_in_ref[...] + te) * msk                           # (M, Cp) f32

        # ---- per-dilation tap-validity masks, computed once ----
        t_idx = t_ref[...]                                           # (M, 1) int32
        tap_masks = {
            d: ((t_idx >= d).astype(jnp.float32),                    # x[t-d] valid
                (t_idx < (T_true - d)).astype(jnp.float32))          # x[t+d] valid
            for d in dils
        }

        def conv3(v, w_ref, b_ref, i, d):
            # dilated 3-tap conv as three accumulated (M,Cp)x(Cp,Cp) dots
            dn_m, up_m = tap_masks[d]
            c = v.astype(jnp.bfloat16)
            dn = (_roll_rows(v, d, M) * dn_m).astype(jnp.bfloat16)    # v[t-d]
            up = (_roll_rows(v, -d, M) * up_m).astype(jnp.bfloat16)   # v[t+d]
            y = jnp.dot(dn, w_ref[i, 0 * Cp:1 * Cp, :],
                        preferred_element_type=jnp.float32)
            y = y + jnp.dot(c, w_ref[i, 1 * Cp:2 * Cp, :],
                            preferred_element_type=jnp.float32)
            y = y + jnp.dot(up, w_ref[i, 2 * Cp:3 * Cp, :],
                            preferred_element_type=jnp.float32)
            return y + b_ref[i]

        # ---- dilated conv encoder (depth static -> unrolled) ----
        for i, (d, use_proj) in enumerate(block_cfg):
            if use_proj:   # 1x1 conv projector on the pre-GELU input
                residual = jnp.dot(h.astype(jnp.bfloat16), wp_ref[i],
                                   preferred_element_type=jnp.float32) + bp_ref[i]
            else:
                residual = h
            y1 = conv3(_gelu(h), w1_ref, b1_ref, i, d)
            y2 = conv3(_gelu(y1), w2_ref, b2_ref, i, d)
            h = y2 + residual

        # lane-dense store of only the lanes the caller keeps (f32 = torch dtype)
        o_ref[...] = h[:, :Cpo].reshape(BB, Tp, Cpo)

    return kernel


def _vmem_limit_bytes(M, Cin, Cp, Cpo, NB):
    bf16, f32 = 2, 4
    weights = (Cin * Cp + NB * (6 * Cp * Cp + Cp * Cp)) * bf16 \
              + (Cp + NB * 3 * Cp) * f32
    io = M * Cin * bf16 + M * Cp * bf16 + M * f32 + M * 4 + M * Cpo * f32
    acts = 12 * M * Cp * f32                      # generous bound on live temps
    est = 2 * (weights + io) + acts + (4 << 20)   # inputs/outputs double-buffered
    # explicit limit (defaults are 16 MiB v5e / 32 MiB v6e,v7x); cap at v7x physical
    return int(min(max(est, 32 << 20), 64 << 20))


def _choose_block_batch(B, Tp):
    # Rows per grid step M = BB*Tp: large enough to amortize per-step overhead
    # and per-block MXU weight pushes, but keep >= 2 grid steps when B >= 2 so
    # the "parallel" batch axis can still split across TensorCores (v7x).
    if B <= 2:
        return 1
    return max(1, min(B // 2, max(1, 1024 // max(Tp, 1))))


def _fused_encoder_call(prep, x_p, te_p, m_p, t_idx, BB, T_true):
    Bp, Tp, Cin = x_p.shape
    Cp, Cpo = prep["Cp"], prep["Cpo"]
    NB = len(prep["block_cfg"])
    M = BB * Tp
    kernel = _make_fused_kernel(BB, Tp, T_true, Cin, Cp, Cpo, prep["block_cfg"])
    # TODO(synk): for long sequences (T in the thousands) on v7x (64 MiB VMEM),
    # tile T with a max-dilation halo / carried edge rows instead of full-T blocks,
    # and single-buffer the grid-invariant weight inputs.
    return pl.pallas_call(
        kernel,
        out_shape=jax.ShapeDtypeStruct((Bp, Tp, Cpo), jnp.float32),
        grid=(Bp // BB,),
        in_specs=[
            pl.BlockSpec((BB, Tp, Cin), lambda b: (b, 0, 0)),        # x (bf16)
            pl.BlockSpec((BB, Tp, Cp), lambda b: (b, 0, 0)),         # time_emb (bf16, lane-padded)
            pl.BlockSpec((BB, Tp, 1), lambda b: (b, 0, 0)),          # mask (f32)
            pl.BlockSpec((M, 1), lambda b: (0, 0)),                  # t-within-sequence (int32)
            pl.BlockSpec((Cin, Cp), lambda b: (0, 0)),               # w_in (bf16)
            pl.BlockSpec((1, Cp), lambda b: (0, 0)),                 # b_in
            pl.BlockSpec((NB, 3 * Cp, Cp), lambda b: (0, 0, 0)),     # w1 (taps stacked, bf16)
            pl.BlockSpec((NB, 1, Cp), lambda b: (0, 0, 0)),          # b1
            pl.BlockSpec((NB, 3 * Cp, Cp), lambda b: (0, 0, 0)),     # w2 (taps stacked, bf16)
            pl.BlockSpec((NB, 1, Cp), lambda b: (0, 0, 0)),          # b2
            pl.BlockSpec((NB, Cp, Cp), lambda b: (0, 0, 0)),         # wp (1x1 projector, bf16)
            pl.BlockSpec((NB, 1, Cp), lambda b: (0, 0, 0)),          # bp
        ],
        out_specs=pl.BlockSpec((BB, Tp, Cpo), lambda b: (b, 0, 0)),
        compiler_params=pltpu.CompilerParams(
            dimension_semantics=("parallel",),
            vmem_limit_bytes=_vmem_limit_bytes(M, Cin, Cp, Cpo, NB)),
    )(x_p, te_p, m_p, t_idx, prep["w_in"], prep["b_in"],
      prep["w1"], prep["b1"], prep["w2"], prep["b2"], prep["wp"], prep["bp"])


# --------------------------------------------------------------------------
# Parameter construction (deterministic, synthetic) + padding/stacking prep
# --------------------------------------------------------------------------
def init_params(key, c_in, hidden, out_dims, depth):
    channels = [hidden] * depth + [out_dims]
    keys = jax.random.split(key, 2 + 6 * len(channels))
    ki = iter(keys)

    def rnd(k, shape, fan_in):
        return (jax.random.normal(k, shape, jnp.float32) / jnp.sqrt(fan_in)).astype(jnp.float32)

    params = {
        "w_in": rnd(next(ki), (c_in, hidden), c_in),
        "b_in": rnd(next(ki), (1, hidden), c_in),
        "blocks": [],
    }
    in_c = hidden
    for i, out_c in enumerate(channels):
        final = (i == len(channels) - 1)
        use_proj = (in_c != out_c) or final
        # NOTE: real PyTorch Conv1d weights are (Cout, Cin, K); load them here as
        # weight.permute(2, 1, 0) -> (K, Cin, Cout).
        blk = {
            "w1": rnd(next(ki), (3, in_c, out_c), 3 * in_c),
            "b1": rnd(next(ki), (1, out_c), 3 * in_c),
            "w2": rnd(next(ki), (3, out_c, out_c), 3 * out_c),
            "b2": rnd(next(ki), (1, out_c), 3 * out_c),
            "wp": rnd(next(ki), (in_c, out_c), in_c) if use_proj
                  else jnp.zeros((in_c, out_c), jnp.float32),
            "bp": rnd(next(ki), (1, out_c), in_c) if use_proj
                  else jnp.zeros((1, out_c), jnp.float32),
            "dilation": 2 ** i,
            "use_proj": use_proj,
        }
        params["blocks"].append(blk)
        in_c = out_c
    return params


def prepare_params(params, hidden, out_dims):
    """Zero-pad all channel dims to a 128-lane multiple, stack per-block weights
    with the 3 conv taps stacked on the contraction axis, cast matmul weights to bf16."""
    Cp = _round_up(max(hidden, out_dims), LANE)
    Cpo = _round_up(out_dims, LANE)
    blocks = params["blocks"]

    def pad_last2(a, r, c):
        pads = [(0, 0)] * (a.ndim - 2) + [(0, r - a.shape[-2]), (0, c - a.shape[-1])]
        return jnp.pad(a, pads)

    w1 = jnp.stack([pad_last2(b["w1"], Cp, Cp).reshape(3 * Cp, Cp) for b in blocks])
    w2 = jnp.stack([pad_last2(b["w2"], Cp, Cp).reshape(3 * Cp, Cp) for b in blocks])
    wp = jnp.stack([pad_last2(b["wp"], Cp, Cp) for b in blocks])
    b1 = jnp.stack([pad_last2(b["b1"], 1, Cp) for b in blocks])
    b2 = jnp.stack([pad_last2(b["b2"], 1, Cp) for b in blocks])
    bp = jnp.stack([pad_last2(b["bp"], 1, Cp) for b in blocks])

    return {
        "Cp": Cp,
        "Cpo": Cpo,
        "hidden": hidden,
        "out_dims": out_dims,
        "block_cfg": tuple((int(b["dilation"]), bool(b["use_proj"])) for b in blocks),
        "w_in": pad_last2(params["w_in"], params["w_in"].shape[0], Cp).astype(jnp.bfloat16),
        "b_in": pad_last2(params["b_in"], 1, Cp).astype(jnp.float32),
        "w1": w1.astype(jnp.bfloat16),
        "b1": b1.astype(jnp.float32),
        "w2": w2.astype(jnp.bfloat16),
        "b2": b2.astype(jnp.float32),
        "wp": wp.astype(jnp.bfloat16),
        "bp": bp.astype(jnp.float32),
    }


# --------------------------------------------------------------------------
# TS2VecEncoderWrapper.forward equivalent
# --------------------------------------------------------------------------
def ts2vec_encoder_forward(prep, x, time_emb, mask_mode="all_true"):
    # x: [B, T, C_in] (may contain NaNs), time_emb: [B, T, hidden]
    B, T, _ = x.shape
    Cp = prep["Cp"]
    hidden = prep["hidden"]

    nan_mask = ~jnp.any(jnp.isnan(x), axis=-1)                        # [B, T]
    x = jnp.nan_to_num(x, nan=0.0)

    if mask_mode == "all_true":
        mode_mask = jnp.ones((B, T), dtype=bool)
    else:
        # TODO(synk): stochastic TS2Vec mask modes ('binomial', 'continuous', ...)
        # need RNG; only the deterministic eval-mode 'all_true' mask is implemented.
        mode_mask = jnp.ones((B, T), dtype=bool)
    mask = (mode_mask & nan_mask).astype(jnp.float32)[..., None]      # [B, T, 1]

    # Pad time to a sublane multiple and batch to a block-batch multiple; padded
    # rows never leak into real rows (conv taps are masked with the true T).
    Tp = _round_up(max(T, SUBLANE), SUBLANE)
    BB = _choose_block_batch(B, Tp)
    Bp = _round_up(B, BB)

    x_p = jnp.pad(x, ((0, Bp - B), (0, Tp - T), (0, 0))).astype(jnp.bfloat16)
    # time_emb is added right after the input projection, before masking
    # (assumption carried over from the reference wrapper); bf16 halves its DMA.
    te_p = jnp.pad(time_emb, ((0, Bp - B), (0, Tp - T),
                              (0, Cp - time_emb.shape[-1]))).astype(jnp.bfloat16)
    m_p = jnp.pad(mask, ((0, Bp - B), (0, Tp - T), (0, 0)))
    t_idx = jnp.tile(jnp.arange(Tp, dtype=jnp.int32), BB).reshape(BB * Tp, 1)

    out_p = _fused_encoder_call(prep, x_p, te_p, m_p, t_idx, BB, T)   # [Bp, Tp, Cpo] f32
    # repr_dropout = identity (eval)
    return out_p[:B, :T, :prep["out_dims"]]


if __name__ == "__main__":
    B, T, C_IN = 2, 8, 4
    HIDDEN, OUT_DIMS, DEPTH = 32, 32, 2

    key = jax.random.PRNGKey(0)
    k_x, k_te, k_p = jax.random.split(key, 3)

    x = jax.random.normal(k_x, (B, T, C_IN), jnp.float32)
    time_emb = jax.random.normal(k_te, (B, T, HIDDEN), jnp.float32)
    params = init_params(k_p, C_IN, HIDDEN, OUT_DIMS, DEPTH)
    prep = prepare_params(params, HIDDEN, OUT_DIMS)

    out = ts2vec_encoder_forward(prep, x, time_emb, mask_mode="all_true")
    out = jax.block_until_ready(out)

    assert out.shape == (B, T, OUT_DIMS)
    assert bool(jnp.all(jnp.isfinite(out)))
    print("KERNEL_OK")
</pallas_src>

<mosaic_0001>
module attributes {stable_mosaic.version = 11 : i64} {
  func.func @kernel(%arg0: i32, %arg1: memref<1x8x4xbf16, #tpu.memory_space<vmem>>, %arg2: memref<1x8x128xbf16, #tpu.memory_space<vmem>>, %arg3: memref<1x8x1xf32, #tpu.memory_space<vmem>>, %arg4: memref<8x1xi32, #tpu.memory_space<vmem>>, %arg5: memref<4x128xbf16, #tpu.memory_space<vmem>>, %arg6: memref<1x128xf32, #tpu.memory_space<vmem>>, %arg7: memref<3x384x128xbf16, #tpu.memory_space<vmem>>, %arg8: memref<3x1x128xf32, #tpu.memory_space<vmem>>, %arg9: memref<3x384x128xbf16, #tpu.memory_space<vmem>>, %arg10: memref<3x1x128xf32, #tpu.memory_space<vmem>>, %arg11: memref<3x128x128xbf16, #tpu.memory_space<vmem>>, %arg12: memref<3x1x128xf32, #tpu.memory_space<vmem>>, %arg13: memref<1x8x128xf32, #tpu.memory_space<vmem>>) attributes {dimension_semantics = [#tpu.dimension_semantics<parallel>], iteration_bounds = array<i64: 2>, scalar_prefetch = 0 : i64, scratch_operands = 0 : i64, tpu.core_type = #tpu.core_type<tc>, window_params = [{transform_indices = @transform_0, window_bounds = array<i64: 1, 8, 4>}, {transform_indices = @transform_1, window_bounds = array<i64: 1, 8, 128>}, {transform_indices = @transform_2, window_bounds = array<i64: 1, 8, 1>}, {pipeline_mode = #tpu.pipeline_mode<synchronous>, transform_indices = @transform_3, window_bounds = array<i64: 8, 1>}, {pipeline_mode = #tpu.pipeline_mode<synchronous>, transform_indices = @transform_4, window_bounds = array<i64: 4, 128>}, {pipeline_mode = #tpu.pipeline_mode<synchronous>, transform_indices = @transform_5, window_bounds = array<i64: 1, 128>}, {pipeline_mode = #tpu.pipeline_mode<synchronous>, transform_indices = @transform_6, window_bounds = array<i64: 3, 384, 128>}, {pipeline_mode = #tpu.pipeline_mode<synchronous>, transform_indices = @transform_7, window_bounds = array<i64: 3, 1, 128>}, {pipeline_mode = #tpu.pipeline_mode<synchronous>, transform_indices = @transform_8, window_bounds = array<i64: 3, 384, 128>}, {pipeline_mode = #tpu.pipeline_mode<synchronous>, transform_indices = @transform_9, window_bounds = array<i64: 3, 1, 128>}, {pipeline_mode = #tpu.pipeline_mode<synchronous>, transform_indices = @transform_10, window_bounds = array<i64: 3, 128, 128>}, {pipeline_mode = #tpu.pipeline_mode<synchronous>, transform_indices = @transform_11, window_bounds = array<i64: 3, 1, 128>}, {transform_indices = @transform_12, window_bounds = array<i64: 1, 8, 128>}]} {
    %c0 = arith.constant 0 : index
    %c0_0 = arith.constant 0 : index
    %c0_1 = arith.constant 0 : index
    %0 = vector.load %arg1[%c0, %c0_0, %c0_1] : memref<1x8x4xbf16, #tpu.memory_space<vmem>>, vector<1x8x4xbf16>
    %1 = vector.shape_cast %0 : vector<1x8x4xbf16> to vector<8x4xbf16>
    %c0_2 = arith.constant 0 : index
    %c0_3 = arith.constant 0 : index
    %2 = vector.load %arg5[%c0_2, %c0_3] : memref<4x128xbf16, #tpu.memory_space<vmem>>, vector<4x128xbf16>
    %cst = arith.constant dense<0.000000e+00> : vector<8x128xf32>
    %3 = tpu.matmul %1, %2, %cst {dimension_numbers = #tpu.dot_dimension_numbers<[1], [0], [0], [1], [0, 0, 1, 1], [], []>} : vector<8x4xbf16>, vector<4x128xbf16>, vector<8x128xf32> -> vector<8x128xf32>
    %c0_4 = arith.constant 0 : index
    %c0_5 = arith.constant 0 : index
    %c0_6 = arith.constant 0 : index
    %4 = vector.load %arg2[%c0_4, %c0_5, %c0_6] : memref<1x8x128xbf16, #tpu.memory_space<vmem>>, vector<1x8x128xbf16>
    %5 = vector.shape_cast %4 : vector<1x8x128xbf16> to vector<8x128xbf16>
    %6 = arith.extf %5 : vector<8x128xbf16> to vector<8x128xf32>
    %c0_7 = arith.constant 0 : index
    %c0_8 = arith.constant 0 : index
    %c0_9 = arith.constant 0 : index
    %7 = vector.load %arg3[%c0_7, %c0_8, %c0_9] : memref<1x8x1xf32, #tpu.memory_space<vmem>>, vector<1x8x1xf32>
    %8 = vector.shape_cast %7 : vector<1x8x1xf32> to vector<8x1xf32>
    %c0_10 = arith.constant 0 : index
    %c0_11 = arith.constant 0 : index
    %9 = vector.load %arg6[%c0_10, %c0_11] : memref<1x128xf32, #tpu.memory_space<vmem>>, vector<1x128xf32>
    %10 = vector.broadcast %9 : vector<1x128xf32> to vector<8x128xf32>
    %11 = arith.addf %3, %10 : vector<8x128xf32>
    %12 = arith.addf %11, %6 : vector<8x128xf32>
    %13 = vector.broadcast %8 : vector<8x1xf32> to vector<8x128xf32>
    %14 = arith.mulf %12, %13 : vector<8x128xf32>
    %c0_12 = arith.constant 0 : index
    %c0_13 = arith.constant 0 : index
    %15 = vector.load %arg4[%c0_12, %c0_13] : memref<8x1xi32, #tpu.memory_space<vmem>>, vector<8x1xi32>
    %c1_i32 = arith.constant 1 : i32
    %16 = vector.broadcast %c1_i32 : i32 to vector<8x1xi32>
    %17 = arith.cmpi sge, %15, %16 : vector<8x1xi32>
    %18 = arith.extui %17 : vector<8x1xi1> to vector<8x1xi32>
    %19 = arith.sitofp %18 : vector<8x1xi32> to vector<8x1xf32>
    %c7_i32 = arith.constant 7 : i32
    %20 = vector.broadcast %c7_i32 : i32 to vector<8x1xi32>
    %21 = arith.cmpi slt, %15, %20 : vector<8x1xi32>
    %22 = arith.extui %21 : vector<8x1xi1> to vector<8x1xi32>
    %23 = arith.sitofp %22 : vector<8x1xi32> to vector<8x1xf32>
    %c2_i32 = arith.constant 2 : i32
    %24 = vector.broadcast %c2_i32 : i32 to vector<8x1xi32>
    %25 = arith.cmpi sge, %15, %24 : vector<8x1xi32>
    %26 = arith.extui %25 : vector<8x1xi1> to vector<8x1xi32>
    %27 = arith.sitofp %26 : vector<8x1xi32> to vector<8x1xf32>
    %c6_i32 = arith.constant 6 : i32
    %28 = vector.broadcast %c6_i32 : i32 to vector<8x1xi32>
    %29 = arith.cmpi slt, %15, %28 : vector<8x1xi32>
    %30 = arith.extui %29 : vector<8x1xi1> to vector<8x1xi32>
    %31 = arith.sitofp %30 : vector<8x1xi32> to vector<8x1xf32>
    %c4_i32 = arith.constant 4 : i32
    %32 = vector.broadcast %c4_i32 : i32 to vector<8x1xi32>
    %33 = arith.cmpi sge, %15, %32 : vector<8x1xi32>
    %34 = arith.extui %33 : vector<8x1xi1> to vector<8x1xi32>
    %35 = arith.sitofp %34 : vector<8x1xi32> to vector<8x1xf32>
    %c4_i32_14 = arith.constant 4 : i32
    %36 = vector.broadcast %c4_i32_14 : i32 to vector<8x1xi32>
    %37 = arith.cmpi slt, %15, %36 : vector<8x1xi32>
    %38 = arith.extui %37 : vector<8x1xi1> to vector<8x1xi32>
    %39 = arith.sitofp %38 : vector<8x1xi32> to vector<8x1xf32>
    %40 = arith.mulf %14, %14 : vector<8x128xf32>
    %41 = arith.mulf %14, %40 : vector<8x128xf32>
    %cst_15 = arith.constant 4.471500e-02 : f32
    %42 = vector.broadcast %cst_15 : f32 to vector<8x128xf32>
    %43 = arith.mulf %42, %41 : vector<8x128xf32>
    %44 = arith.addf %14, %43 : vector<8x128xf32>
    %cst_16 = arith.constant 0.797884583 : f32
    %45 = vector.broadcast %cst_16 : f32 to vector<8x128xf32>
    %46 = arith.mulf %45, %44 : vector<8x128xf32>
    %47 = math.tanh %46 : vector<8x128xf32>
    %cst_17 = arith.constant 1.000000e+00 : f32
    %48 = vector.broadcast %cst_17 : f32 to vector<8x128xf32>
    %49 = arith.addf %48, %47 : vector<8x128xf32>
    %cst_18 = arith.constant 5.000000e-01 : f32
    %50 = vector.broadcast %cst_18 : f32 to vector<8x128xf32>
    %51 = arith.mulf %50, %49 : vector<8x128xf32>
    %52 = arith.mulf %14, %51 : vector<8x128xf32>
    %53 = arith.truncf %52 : vector<8x128xf32> to vector<8x128xbf16>
    %c1_i32_19 = arith.constant 1 : i32
    %54 = tpu.dynamic_rotate %52 by %c1_i32_19 dim 0 : vector<8x128xf32>, i32 -> vector<8x128xf32>
    %55 = vector.broadcast %19 : vector<8x1xf32> to vector<8x128xf32>
    %56 = arith.mulf %54, %55 : vector<8x128xf32>
    %57 = arith.truncf %56 : vector<8x128xf32> to vector<8x128xbf16>
    %c7_i32_20 = arith.constant 7 : i32
    %58 = tpu.dynamic_rotate %52 by %c7_i32_20 dim 0 : vector<8x128xf32>, i32 -> vector<8x128xf32>
    %59 = vector.broadcast %23 : vector<8x1xf32> to vector<8x128xf32>
    %60 = arith.mulf %58, %59 : vector<8x128xf32>
    %61 = arith.truncf %60 : vector<8x128xf32> to vector<8x128xbf16>
    %c0_21 = arith.constant 0 : index
    %c0_22 = arith.constant 0 : index
    %c0_23 = arith.constant 0 : index
    %62 = vector.load %arg7[%c0_21, %c0_22, %c0_23] : memref<3x384x128xbf16, #tpu.memory_space<vmem>>, vector<1x128x128xbf16>
    %63 = vector.shape_cast %62 : vector<1x128x128xbf16> to vector<128x128xbf16>
    %cst_24 = arith.constant dense<0.000000e+00> : vector<8x128xf32>
    %64 = tpu.matmul %57, %63, %cst_24 {dimension_numbers = #tpu.dot_dimension_numbers<[1], [0], [0], [1], [0, 0, 1, 1], [], []>} : vector<8x128xbf16>, vector<128x128xbf16>, vector<8x128xf32> -> vector<8x128xf32>
    %c0_25 = arith.constant 0 : index
    %c128 = arith.constant 128 : index
    %c0_26 = arith.constant 0 : index
    %65 = vector.load %arg7[%c0_25, %c128, %c0_26] : memref<3x384x128xbf16, #tpu.memory_space<vmem>>, vector<1x128x128xbf16>
    %66 = vector.shape_cast %65 : vector<1x128x128xbf16> to vector<128x128xbf16>
    %cst_27 = arith.constant dense<0.000000e+00> : vector<8x128xf32>
    %67 = tpu.matmul %53, %66, %cst_27 {dimension_numbers = #tpu.dot_dimension_numbers<[1], [0], [0], [1], [0, 0, 1, 1], [], []>} : vector<8x128xbf16>, vector<128x128xbf16>, vector<8x128xf32> -> vector<8x128xf32>
    %68 = arith.addf %64, %67 : vector<8x128xf32>
    %c0_28 = arith.constant 0 : index
    %c256 = arith.constant 256 : index
    %c0_29 = arith.constant 0 : index
    %69 = vector.load %arg7[%c0_28, %c256, %c0_29] : memref<3x384x128xbf16, #tpu.memory_space<vmem>>, vector<1x128x128xbf16>
    %70 = vector.shape_cast %69 : vector<1x128x128xbf16> to vector<128x128xbf16>
    %cst_30 = arith.constant dense<0.000000e+00> : vector<8x128xf32>
    %71 = tpu.matmul %61, %70, %cst_30 {dimension_numbers = #tpu.dot_dimension_numbers<[1], [0], [0], [1], [0, 0, 1, 1], [], []>} : vector<8x128xbf16>, vector<128x128xbf16>, vector<8x128xf32> -> vector<8x128xf32>
    %72 = arith.addf %68, %71 : vector<8x128xf32>
    %c0_31 = arith.constant 0 : index
    %c0_32 = arith.constant 0 : index
    %c0_33 = arith.constant 0 : index
    %73 = vector.load %arg8[%c0_31, %c0_32, %c0_33] : memref<3x1x128xf32, #tpu.memory_space<vmem>>, vector<1x1x128xf32>
    %74 = vector.shape_cast %73 : vector<1x1x128xf32> to vector<1x128xf32>
    %75 = vector.broadcast %74 : vector<1x128xf32> to vector<8x128xf32>
    %76 = arith.addf %72, %75 : vector<8x128xf32>
    %77 = arith.mulf %76, %76 : vector<8x128xf32>
    %78 = arith.mulf %76, %77 : vector<8x128xf32>
    %cst_34 = arith.constant 4.471500e-02 : f32
    %79 = vector.broadcast %cst_34 : f32 to vector<8x128xf32>
    %80 = arith.mulf %79, %78 : vector<8x128xf32>
    %81 = arith.addf %76, %80 : vector<8x128xf32>
    %cst_35 = arith.constant 0.797884583 : f32
    %82 = vector.broadcast %cst_35 : f32 to vector<8x128xf32>
    %83 = arith.mulf %82, %81 : vector<8x128xf32>
    %84 = math.tanh %83 : vector<8x128xf32>
    %cst_36 = arith.constant 1.000000e+00 : f32
    %85 = vector.broadcast %cst_36 : f32 to vector<8x128xf32>
    %86 = arith.addf %85, %84 : vector<8x128xf32>
    %cst_37 = arith.constant 5.000000e-01 : f32
    %87 = vector.broadcast %cst_37 : f32 to vector<8x128xf32>
    %88 = arith.mulf %87, %86 : vector<8x128xf32>
    %89 = arith.mulf %76, %88 : vector<8x128xf32>
    %90 = arith.truncf %89 : vector<8x128xf32> to vector<8x128xbf16>
    %c1_i32_38 = arith.constant 1 : i32
    %91 = tpu.dynamic_rotate %89 by %c1_i32_38 dim 0 : vector<8x128xf32>, i32 -> vector<8x128xf32>
    %92 = vector.broadcast %19 : vector<8x1xf32> to vector<8x128xf32>
    %93 = arith.mulf %91, %92 : vector<8x128xf32>
    %94 = arith.truncf %93 : vector<8x128xf32> to vector<8x128xbf16>
    %c7_i32_39 = arith.constant 7 : i32
    %95 = tpu.dynamic_rotate %89 by %c7_i32_39 dim 0 : vector<8x128xf32>, i32 -> vector<8x128xf32>
    %96 = vector.broadcast %23 : vector<8x1xf32> to vector<8x128xf32>
    %97 = arith.mulf %95, %96 : vector<8x128xf32>
    %98 = arith.truncf %97 : vector<8x128xf32> to vector<8x128xbf16>
    %c0_40 = arith.constant 0 : index
    %c0_41 = arith.constant 0 : index
    %c0_42 = arith.constant 0 : index
    %99 = vector.load %arg9[%c0_40, %c0_41, %c0_42] : memref<3x384x128xbf16, #tpu.memory_space<vmem>>, vector<1x128x128xbf16>
    %100 = vector.shape_cast %99 : vector<1x128x128xbf16> to vector<128x128xbf16>
    %cst_43 = arith.constant dense<0.000000e+00> : vector<8x128xf32>
    %101 = tpu.matmul %94, %100, %cst_43 {dimension_numbers = #tpu.dot_dimension_numbers<[1], [0], [0], [1], [0, 0, 1, 1], [], []>} : vector<8x128xbf16>, vector<128x128xbf16>, vector<8x128xf32> -> vector<8x128xf32>
    %c0_44 = arith.constant 0 : index
    %c128_45 = arith.constant 128 : index
    %c0_46 = arith.constant 0 : index
    %102 = vector.load %arg9[%c0_44, %c128_45, %c0_46] : memref<3x384x128xbf16, #tpu.memory_space<vmem>>, vector<1x128x128xbf16>
    %103 = vector.shape_cast %102 : vector<1x128x128xbf16> to vector<128x128xbf16>
    %cst_47 = arith.constant dense<0.000000e+00> : vector<8x128xf32>
    %104 = tpu.matmul %90, %103, %cst_47 {dimension_numbers = #tpu.dot_dimension_numbers<[1], [0], [0], [1], [0, 0, 1, 1], [], []>} : vector<8x128xbf16>, vector<128x128xbf16>, vector<8x128xf32> -> vector<8x128xf32>
    %105 = arith.addf %101, %104 : vector<8x128xf32>
    %c0_48 = arith.constant 0 : index
    %c256_49 = arith.constant 256 : index
    %c0_50 = arith.constant 0 : index
    %106 = vector.load %arg9[%c0_48, %c256_49, %c0_50] : memref<3x384x128xbf16, #tpu.memory_space<vmem>>, vector<1x128x128xbf16>
    %107 = vector.shape_cast %106 : vector<1x128x128xbf16> to vector<128x128xbf16>
    %cst_51 = arith.constant dense<0.000000e+00> : vector<8x128xf32>
    %108 = tpu.matmul %98, %107, %cst_51 {dimension_numbers = #tpu.dot_dimension_numbers<[1], [0], [0], [1], [0, 0, 1, 1], [], []>} : vector<8x128xbf16>, vector<128x128xbf16>, vector<8x128xf32> -> vector<8x128xf32>
    %109 = arith.addf %105, %108 : vector<8x128xf32>
    %c0_52 = arith.constant 0 : index
    %c0_53 = arith.constant 0 : index
    %c0_54 = arith.constant 0 : index
    %110 = vector.load %arg10[%c0_52, %c0_53, %c0_54] : memref<3x1x128xf32, #tpu.memory_space<vmem>>, vector<1x1x128xf32>
    %111 = vector.shape_cast %110 : vector<1x1x128xf32> to vector<1x128xf32>
    %112 = vector.broadcast %111 : vector<1x128xf32> to vector<8x128xf32>
    %113 = arith.addf %109, %112 : vector<8x128xf32>
    %114 = arith.addf %113, %14 : vector<8x128xf32>
    %115 = arith.mulf %114, %114 : vector<8x128xf32>
    %116 = arith.mulf %114, %115 : vector<8x128xf32>
    %cst_55 = arith.constant 4.471500e-02 : f32
    %117 = vector.broadcast %cst_55 : f32 to vector<8x128xf32>
    %118 = arith.mulf %117, %116 : vector<8x128xf32>
    %119 = arith.addf %114, %118 : vector<8x128xf32>
    %cst_56 = arith.constant 0.797884583 : f32
    %120 = vector.broadcast %cst_56 : f32 to vector<8x128xf32>
    %121 = arith.mulf %120, %119 : vector<8x128xf32>
    %122 = math.tanh %121 : vector<8x128xf32>
    %cst_57 = arith.constant 1.000000e+00 : f32
    %123 = vector.broadcast %cst_57 : f32 to vector<8x128xf32>
    %124 = arith.addf %123, %122 : vector<8x128xf32>
    %cst_58 = arith.constant 5.000000e-01 : f32
    %125 = vector.broadcast %cst_58 : f32 to vector<8x128xf32>
    %126 = arith.mulf %125, %124 : vector<8x128xf32>
    %127 = arith.mulf %114, %126 : vector<8x128xf32>
    %128 = arith.truncf %127 : vector<8x128xf32> to vector<8x128xbf16>
    %c2_i32_59 = arith.constant 2 : i32
    %129 = tpu.dynamic_rotate %127 by %c2_i32_59 dim 0 : vector<8x128xf32>, i32 -> vector<8x128xf32>
    %130 = vector.broadcast %27 : vector<8x1xf32> to vector<8x128xf32>
    %131 = arith.mulf %129, %130 : vector<8x128xf32>
    %132 = arith.truncf %131 : vector<8x128xf32> to vector<8x128xbf16>
    %c6_i32_60 = arith.constant 6 : i32
    %133 = tpu.dynamic_rotate %127 by %c6_i32_60 dim 0 : vector<8x128xf32>, i32 -> vector<8x128xf32>
    %134 = vector.broadcast %31 : vector<8x1xf32> to vector<8x128xf32>
    %135 = arith.mulf %133, %134 : vector<8x128xf32>
    %136 = arith.truncf %135 : vector<8x128xf32> to vector<8x128xbf16>
    %c1 = arith.constant 1 : index
    %c0_61 = arith.constant 0 : index
    %c0_62 = arith.constant 0 : index
    %137 = vector.load %arg7[%c1, %c0_61, %c0_62] : memref<3x384x128xbf16, #tpu.memory_space<vmem>>, vector<1x128x128xbf16>
    %138 = vector.shape_cast %137 : vector<1x128x128xbf16> to vector<128x128xbf16>
    %cst_63 = arith.constant dense<0.000000e+00> : vector<8x128xf32>
    %139 = tpu.matmul %132, %138, %cst_63 {dimension_numbers = #tpu.dot_dimension_numbers<[1], [0], [0], [1], [0, 0, 1, 1], [], []>} : vector<8x128xbf16>, vector<128x128xbf16>, vector<8x128xf32> -> vector<8x128xf32>
    %c1_64 = arith.constant 1 : index
    %c128_65 = arith.constant 128 : index
    %c0_66 = arith.constant 0 : index
    %140 = vector.load %arg7[%c1_64, %c128_65, %c0_66] : memref<3x384x128xbf16, #tpu.memory_space<vmem>>, vector<1x128x128xbf16>
    %141 = vector.shape_cast %140 : vector<1x128x128xbf16> to vector<128x128xbf16>
    %cst_67 = arith.constant dense<0.000000e+00> : vector<8x128xf32>
    %142 = tpu.matmul %128, %141, %cst_67 {dimension_numbers = #tpu.dot_dimension_numbers<[1], [0], [0], [1], [0, 0, 1, 1], [], []>} : vector<8x128xbf16>, vector<128x128xbf16>, vector<8x128xf32> -> vector<8x128xf32>
    %143 = arith.addf %139, %142 : vector<8x128xf32>
    %c1_68 = arith.constant 1 : index
    %c256_69 = arith.constant 256 : index
    %c0_70 = arith.constant 0 : index
    %144 = vector.load %arg7[%c1_68, %c256_69, %c0_70] : memref<3x384x128xbf16, #tpu.memory_space<vmem>>, vector<1x128x128xbf16>
    %145 = vector.shape_cast %144 : vector<1x128x128xbf16> to vector<128x128xbf16>
    %cst_71 = arith.constant dense<0.000000e+00> : vector<8x128xf32>
    %146 = tpu.matmul %136, %145, %cst_71 {dimension_numbers = #tpu.dot_dimension_numbers<[1], [0], [0], [1], [0, 0, 1, 1], [], []>} : vector<8x128xbf16>, vector<128x128xbf16>, vector<8x128xf32> -> vector<8x128xf32>
    %147 = arith.addf %143, %146 : vector<8x128xf32>
    %c1_72 = arith.constant 1 : index
    %c0_73 = arith.constant 0 : index
    %c0_74 = arith.constant 0 : index
    %148 = vector.load %arg8[%c1_72, %c0_73, %c0_74] : memref<3x1x128xf32, #tpu.memory_space<vmem>>, vector<1x1x128xf32>
    %149 = vector.shape_cast %148 : vector<1x1x128xf32> to vector<1x128xf32>
    %150 = vector.broadcast %149 : vector<1x128xf32> to vector<8x128xf32>
    %151 = arith.addf %147, %150 : vector<8x128xf32>
    %152 = arith.mulf %151, %151 : vector<8x128xf32>
    %153 = arith.mulf %151, %152 : vector<8x128xf32>
    %cst_75 = arith.constant 4.471500e-02 : f32
    %154 = vector.broadcast %cst_75 : f32 to vector<8x128xf32>
    %155 = arith.mulf %154, %153 : vector<8x128xf32>
    %156 = arith.addf %151, %155 : vector<8x128xf32>
    %cst_76 = arith.constant 0.797884583 : f32
    %157 = vector.broadcast %cst_76 : f32 to vector<8x128xf32>
    %158 = arith.mulf %157, %156 : vector<8x128xf32>
    %159 = math.tanh %158 : vector<8x128xf32>
    %cst_77 = arith.constant 1.000000e+00 : f32
    %160 = vector.broadcast %cst_77 : f32 to vector<8x128xf32>
    %161 = arith.addf %160, %159 : vector<8x128xf32>
    %cst_78 = arith.constant 5.000000e-01 : f32
    %162 = vector.broadcast %cst_78 : f32 to vector<8x128xf32>
    %163 = arith.mulf %162, %161 : vector<8x128xf32>
    %164 = arith.mulf %151, %163 : vector<8x128xf32>
    %165 = arith.truncf %164 : vector<8x128xf32> to vector<8x128xbf16>
    %c2_i32_79 = arith.constant 2 : i32
    %166 = tpu.dynamic_rotate %164 by %c2_i32_79 dim 0 : vector<8x128xf32>, i32 -> vector<8x128xf32>
    %167 = vector.broadcast %27 : vector<8x1xf32> to vector<8x128xf32>
    %168 = arith.mulf %166, %167 : vector<8x128xf32>
    %169 = arith.truncf %168 : vector<8x128xf32> to vector<8x128xbf16>
    %c6_i32_80 = arith.constant 6 : i32
    %170 = tpu.dynamic_rotate %164 by %c6_i32_80 dim 0 : vector<8x128xf32>, i32 -> vector<8x128xf32>
    %171 = vector.broadcast %31 : vector<8x1xf32> to vector<8x128xf32>
    %172 = arith.mulf %170, %171 : vector<8x128xf32>
    %173 = arith.truncf %172 : vector<8x128xf32> to vector<8x128xbf16>
    %c1_81 = arith.constant 1 : index
    %c0_82 = arith.constant 0 : index
    %c0_83 = arith.constant 0 : index
    %174 = vector.load %arg9[%c1_81, %c0_82, %c0_83] : memref<3x384x128xbf16, #tpu.memory_space<vmem>>, vector<1x128x128xbf16>
    %175 = vector.shape_cast %174 : vector<1x128x128xbf16> to vector<128x128xbf16>
    %cst_84 = arith.constant dense<0.000000e+00> : vector<8x128xf32>
    %176 = tpu.matmul %169, %175, %cst_84 {dimension_numbers = #tpu.dot_dimension_numbers<[1], [0], [0], [1], [0, 0, 1, 1], [], []>} : vector<8x128xbf16>, vector<128x128xbf16>, vector<8x128xf32> -> vector<8x128xf32>
    %c1_85 = arith.constant 1 : index
    %c128_86 = arith.constant 128 : index
    %c0_87 = arith.constant 0 : index
    %177 = vector.load %arg9[%c1_85, %c128_86, %c0_87] : memref<3x384x128xbf16, #tpu.memory_space<vmem>>, vector<1x128x128xbf16>
    %178 = vector.shape_cast %177 : vector<1x128x128xbf16> to vector<128x128xbf16>
    %cst_88 = arith.constant dense<0.000000e+00> : vector<8x128xf32>
    %179 = tpu.matmul %165, %178, %cst_88 {dimension_numbers = #tpu.dot_dimension_numbers<[1], [0], [0], [1], [0, 0, 1, 1], [], []>} : vector<8x128xbf16>, vector<128x128xbf16>, vector<8x128xf32> -> vector<8x128xf32>
    %180 = arith.addf %176, %179 : vector<8x128xf32>
    %c1_89 = arith.constant 1 : index
    %c256_90 = arith.constant 256 : index
    %c0_91 = arith.constant 0 : index
    %181 = vector.load %arg9[%c1_89, %c256_90, %c0_91] : memref<3x384x128xbf16, #tpu.memory_space<vmem>>, vector<1x128x128xbf16>
    %182 = vector.shape_cast %181 : vector<1x128x128xbf16> to vector<128x128xbf16>
    %cst_92 = arith.constant dense<0.000000e+00> : vector<8x128xf32>
    %183 = tpu.matmul %173, %182, %cst_92 {dimension_numbers = #tpu.dot_dimension_numbers<[1], [0], [0], [1], [0, 0, 1, 1], [], []>} : vector<8x128xbf16>, vector<128x128xbf16>, vector<8x128xf32> -> vector<8x128xf32>
    %184 = arith.addf %180, %183 : vector<8x128xf32>
    %c1_93 = arith.constant 1 : index
    %c0_94 = arith.constant 0 : index
    %c0_95 = arith.constant 0 : index
    %185 = vector.load %arg10[%c1_93, %c0_94, %c0_95] : memref<3x1x128xf32, #tpu.memory_space<vmem>>, vector<1x1x128xf32>
    %186 = vector.shape_cast %185 : vector<1x1x128xf32> to vector<1x128xf32>
    %187 = vector.broadcast %186 : vector<1x128xf32> to vector<8x128xf32>
    %188 = arith.addf %184, %187 : vector<8x128xf32>
    %189 = arith.addf %188, %114 : vector<8x128xf32>
    %190 = arith.truncf %189 : vector<8x128xf32> to vector<8x128xbf16>
    %c2 = arith.constant 2 : index
    %c0_96 = arith.constant 0 : index
    %c0_97 = arith.constant 0 : index
    %191 = vector.load %arg11[%c2, %c0_96, %c0_97] : memref<3x128x128xbf16, #tpu.memory_space<vmem>>, vector<1x128x128xbf16>
    %192 = vector.shape_cast %191 : vector<1x128x128xbf16> to vector<128x128xbf16>
    %cst_98 = arith.constant dense<0.000000e+00> : vector<8x128xf32>
    %193 = tpu.matmul %190, %192, %cst_98 {dimension_numbers = #tpu.dot_dimension_numbers<[1], [0], [0], [1], [0, 0, 1, 1], [], []>} : vector<8x128xbf16>, vector<128x128xbf16>, vector<8x128xf32> -> vector<8x128xf32>
    %c2_99 = arith.constant 2 : index
    %c0_100 = arith.constant 0 : index
    %c0_101 = arith.constant 0 : index
    %194 = vector.load %arg12[%c2_99, %c0_100, %c0_101] : memref<3x1x128xf32, #tpu.memory_space<vmem>>, vector<1x1x128xf32>
    %195 = vector.shape_cast %194 : vector<1x1x128xf32> to vector<1x128xf32>
    %196 = vector.broadcast %195 : vector<1x128xf32> to vector<8x128xf32>
    %197 = arith.addf %193, %196 : vector<8x128xf32>
    %198 = arith.mulf %189, %189 : vector<8x128xf32>
    %199 = arith.mulf %189, %198 : vector<8x128xf32>
    %cst_102 = arith.constant 4.471500e-02 : f32
    %200 = vector.broadcast %cst_102 : f32 to vector<8x128xf32>
    %201 = arith.mulf %200, %199 : vector<8x128xf32>
    %202 = arith.addf %189, %201 : vector<8x128xf32>
    %cst_103 = arith.constant 0.797884583 : f32
    %203 = vector.broadcast %cst_103 : f32 to vector<8x128xf32>
    %204 = arith.mulf %203, %202 : vector<8x128xf32>
    %205 = math.tanh %204 : vector<8x128xf32>
    %cst_104 = arith.constant 1.000000e+00 : f32
    %206 = vector.broadcast %cst_104 : f32 to vector<8x128xf32>
    %207 = arith.addf %206, %205 : vector<8x128xf32>
    %cst_105 = arith.constant 5.000000e-01 : f32
    %208 = vector.broadcast %cst_105 : f32 to vector<8x128xf32>
    %209 = arith.mulf %208, %207 : vector<8x128xf32>
    %210 = arith.mulf %189, %209 : vector<8x128xf32>
    %211 = arith.truncf %210 : vector<8x128xf32> to vector<8x128xbf16>
    %c4_i32_106 = arith.constant 4 : i32
    %212 = tpu.dynamic_rotate %210 by %c4_i32_106 dim 0 : vector<8x128xf32>, i32 -> vector<8x128xf32>
    %213 = vector.broadcast %35 : vector<8x1xf32> to vector<8x128xf32>
    %214 = arith.mulf %212, %213 : vector<8x128xf32>
    %215 = arith.truncf %214 : vector<8x128xf32> to vector<8x128xbf16>
    %c4_i32_107 = arith.constant 4 : i32
    %216 = tpu.dynamic_rotate %210 by %c4_i32_107 dim 0 : vector<8x128xf32>, i32 -> vector<8x128xf32>
    %217 = vector.broadcast %39 : vector<8x1xf32> to vector<8x128xf32>
    %218 = arith.mulf %216, %217 : vector<8x128xf32>
    %219 = arith.truncf %218 : vector<8x128xf32> to vector<8x128xbf16>
    %c2_108 = arith.constant 2 : index
    %c0_109 = arith.constant 0 : index
    %c0_110 = arith.constant 0 : index
    %220 = vector.load %arg7[%c2_108, %c0_109, %c0_110] : memref<3x384x128xbf16, #tpu.memory_space<vmem>>, vector<1x128x128xbf16>
    %221 = vector.shape_cast %220 : vector<1x128x128xbf16> to vector<128x128xbf16>
    %cst_111 = arith.constant dense<0.000000e+00> : vector<8x128xf32>
    %222 = tpu.matmul %215, %221, %cst_111 {dimension_numbers = #tpu.dot_dimension_numbers<[1], [0], [0], [1], [0, 0, 1, 1], [], []>} : vector<8x128xbf16>, vector<128x128xbf16>, vector<8x128xf32> -> vector<8x128xf32>
    %c2_112 = arith.constant 2 : index
    %c128_113 = arith.constant 128 : index
    %c0_114 = arith.constant 0 : index
    %223 = vector.load %arg7[%c2_112, %c128_113, %c0_114] : memref<3x384x128xbf16, #tpu.memory_space<vmem>>, vector<1x128x128xbf16>
    %224 = vector.shape_cast %223 : vector<1x128x128xbf16> to vector<128x128xbf16>
    %cst_115 = arith.constant dense<0.000000e+00> : vector<8x128xf32>
    %225 = tpu.matmul %211, %224, %cst_115 {dimension_numbers = #tpu.dot_dimension_numbers<[1], [0], [0], [1], [0, 0, 1, 1], [], []>} : vector<8x128xbf16>, vector<128x128xbf16>, vector<8x128xf32> -> vector<8x128xf32>
    %226 = arith.addf %222, %225 : vector<8x128xf32>
    %c2_116 = arith.constant 2 : index
    %c256_117 = arith.constant 256 : index
    %c0_118 = arith.constant 0 : index
    %227 = vector.load %arg7[%c2_116, %c256_117, %c0_118] : memref<3x384x128xbf16, #tpu.memory_space<vmem>>, vector<1x128x128xbf16>
    %228 = vector.shape_cast %227 : vector<1x128x128xbf16> to vector<128x128xbf16>
    %cst_119 = arith.constant dense<0.000000e+00> : vector<8x128xf32>
    %229 = tpu.matmul %219, %228, %cst_119 {dimension_numbers = #tpu.dot_dimension_numbers<[1], [0], [0], [1], [0, 0, 1, 1], [], []>} : vector<8x128xbf16>, vector<128x128xbf16>, vector<8x128xf32> -> vector<8x128xf32>
    %230 = arith.addf %226, %229 : vector<8x128xf32>
    %c2_120 = arith.constant 2 : index
    %c0_121 = arith.constant 0 : index
    %c0_122 = arith.constant 0 : index
    %231 = vector.load %arg8[%c2_120, %c0_121, %c0_122] : memref<3x1x128xf32, #tpu.memory_space<vmem>>, vector<1x1x128xf32>
    %232 = vector.shape_cast %231 : vector<1x1x128xf32> to vector<1x128xf32>
    %233 = vector.broadcast %232 : vector<1x128xf32> to vector<8x128xf32>
    %234 = arith.addf %230, %233 : vector<8x128xf32>
    %235 = arith.mulf %234, %234 : vector<8x128xf32>
    %236 = arith.mulf %234, %235 : vector<8x128xf32>
    %cst_123 = arith.constant 4.471500e-02 : f32
    %237 = vector.broadcast %cst_123 : f32 to vector<8x128xf32>
    %238 = arith.mulf %237, %236 : vector<8x128xf32>
    %239 = arith.addf %234, %238 : vector<8x128xf32>
    %cst_124 = arith.constant 0.797884583 : f32
    %240 = vector.broadcast %cst_124 : f32 to vector<8x128xf32>
    %241 = arith.mulf %240, %239 : vector<8x128xf32>
    %242 = math.tanh %241 : vector<8x128xf32>
    %cst_125 = arith.constant 1.000000e+00 : f32
    %243 = vector.broadcast %cst_125 : f32 to vector<8x128xf32>
    %244 = arith.addf %243, %242 : vector<8x128xf32>
    %cst_126 = arith.constant 5.000000e-01 : f32
    %245 = vector.broadcast %cst_126 : f32 to vector<8x128xf32>
    %246 = arith.mulf %245, %244 : vector<8x128xf32>
    %247 = arith.mulf %234, %246 : vector<8x128xf32>
    %248 = arith.truncf %247 : vector<8x128xf32> to vector<8x128xbf16>
    %c4_i32_127 = arith.constant 4 : i32
    %249 = tpu.dynamic_rotate %247 by %c4_i32_127 dim 0 : vector<8x128xf32>, i32 -> vector<8x128xf32>
    %250 = vector.broadcast %35 : vector<8x1xf32> to vector<8x128xf32>
    %251 = arith.mulf %249, %250 : vector<8x128xf32>
    %252 = arith.truncf %251 : vector<8x128xf32> to vector<8x128xbf16>
    %c4_i32_128 = arith.constant 4 : i32
    %253 = tpu.dynamic_rotate %247 by %c4_i32_128 dim 0 : vector<8x128xf32>, i32 -> vector<8x128xf32>
    %254 = vector.broadcast %39 : vector<8x1xf32> to vector<8x128xf32>
    %255 = arith.mulf %253, %254 : vector<8x128xf32>
    %256 = arith.truncf %255 : vector<8x128xf32> to vector<8x128xbf16>
    %c2_129 = arith.constant 2 : index
    %c0_130 = arith.constant 0 : index
    %c0_131 = arith.constant 0 : index
    %257 = vector.load %arg9[%c2_129, %c0_130, %c0_131] : memref<3x384x128xbf16, #tpu.memory_space<vmem>>, vector<1x128x128xbf16>
    %258 = vector.shape_cast %257 : vector<1x128x128xbf16> to vector<128x128xbf16>
    %cst_132 = arith.constant dense<0.000000e+00> : vector<8x128xf32>
    %259 = tpu.matmul %252, %258, %cst_132 {dimension_numbers = #tpu.dot_dimension_numbers<[1], [0], [0], [1], [0, 0, 1, 1], [], []>} : vector<8x128xbf16>, vector<128x128xbf16>, vector<8x128xf32> -> vector<8x128xf32>
    %c2_133 = arith.constant 2 : index
    %c128_134 = arith.constant 128 : index
    %c0_135 = arith.constant 0 : index
    %260 = vector.load %arg9[%c2_133, %c128_134, %c0_135] : memref<3x384x128xbf16, #tpu.memory_space<vmem>>, vector<1x128x128xbf16>
    %261 = vector.shape_cast %260 : vector<1x128x128xbf16> to vector<128x128xbf16>
    %cst_136 = arith.constant dense<0.000000e+00> : vector<8x128xf32>
    %262 = tpu.matmul %248, %261, %cst_136 {dimension_numbers = #tpu.dot_dimension_numbers<[1], [0], [0], [1], [0, 0, 1, 1], [], []>} : vector<8x128xbf16>, vector<128x128xbf16>, vector<8x128xf32> -> vector<8x128xf32>
    %263 = arith.addf %259, %262 : vector<8x128xf32>
    %c2_137 = arith.constant 2 : index
    %c256_138 = arith.constant 256 : index
    %c0_139 = arith.constant 0 : index
    %264 = vector.load %arg9[%c2_137, %c256_138, %c0_139] : memref<3x384x128xbf16, #tpu.memory_space<vmem>>, vector<1x128x128xbf16>
    %265 = vector.shape_cast %264 : vector<1x128x128xbf16> to vector<128x128xbf16>
    %cst_140 = arith.constant dense<0.000000e+00> : vector<8x128xf32>
    %266 = tpu.matmul %256, %265, %cst_140 {dimension_numbers = #tpu.dot_dimension_numbers<[1], [0], [0], [1], [0, 0, 1, 1], [], []>} : vector<8x128xbf16>, vector<128x128xbf16>, vector<8x128xf32> -> vector<8x128xf32>
    %267 = arith.addf %263, %266 : vector<8x128xf32>
    %c2_141 = arith.constant 2 : index
    %c0_142 = arith.constant 0 : index
    %c0_143 = arith.constant 0 : index
    %268 = vector.load %arg10[%c2_141, %c0_142, %c0_143] : memref<3x1x128xf32, #tpu.memory_space<vmem>>, vector<1x1x128xf32>
    %269 = vector.shape_cast %268 : vector<1x1x128xf32> to vector<1x128xf32>
    %270 = vector.broadcast %269 : vector<1x128xf32> to vector<8x128xf32>
    %271 = arith.addf %267, %270 : vector<8x128xf32>
    %272 = arith.addf %271, %197 : vector<8x128xf32>
    %273 = vector.shape_cast %272 : vector<8x128xf32> to vector<1x8x128xf32>
    %c0_144 = arith.constant 0 : index
    %c0_145 = arith.constant 0 : index
    %c0_146 = arith.constant 0 : index
    %274 = vector.load %arg13[%c0_144, %c0_145, %c0_146] : memref<1x8x128xf32, #tpu.memory_space<vmem>>, vector<1x8x128xf32>
    tpu.vector_store %arg13[%c0_144, %c0_145, %c0_146], %273 {strides = array<i32>} : memref<1x8x128xf32, #tpu.memory_space<vmem>>, vector<1x8x128xf32>,
    return
  }
  func.func @transform_0(%arg0: i32) -> (i32, i32, i32) {
    %c0_i32 = arith.constant 0 : i32
    %c0_i32_0 = arith.constant 0 : i32
    %c0_i32_1 = arith.constant 0 : i32
    return %arg0, %c0_i32, %c0_i32_0 : i32, i32, i32
  }
  func.func @transform_1(%arg0: i32) -> (i32, i32, i32) {
    %c0_i32 = arith.constant 0 : i32
    %c0_i32_0 = arith.constant 0 : i32
    %c0_i32_1 = arith.constant 0 : i32
    return %arg0, %c0_i32, %c0_i32_0 : i32, i32, i32
  }
  func.func @transform_2(%arg0: i32) -> (i32, i32, i32) {
    %c0_i32 = arith.constant 0 : i32
    %c0_i32_0 = arith.constant 0 : i32
    %c0_i32_1 = arith.constant 0 : i32
    return %arg0, %c0_i32, %c0_i32_0 : i32, i32, i32
  }
  func.func @transform_3(%arg0: i32) -> (i32, i32) {
    %c0_i32 = arith.constant 0 : i32
    %c0_i32_0 = arith.constant 0 : i32
    %c0_i32_1 = arith.constant 0 : i32
    return %c0_i32, %c0_i32_0 : i32, i32
  }
  func.func @transform_4(%arg0: i32) -> (i32, i32) {
    %c0_i32 = arith.constant 0 : i32
    %c0_i32_0 = arith.constant 0 : i32
    %c0_i32_1 = arith.constant 0 : i32
    return %c0_i32, %c0_i32_0 : i32, i32
  }
  func.func @transform_5(%arg0: i32) -> (i32, i32) {
    %c0_i32 = arith.constant 0 : i32
    %c0_i32_0 = arith.constant 0 : i32
    %c0_i32_1 = arith.constant 0 : i32
    return %c0_i32, %c0_i32_0 : i32, i32
  }
  func.func @transform_6(%arg0: i32) -> (i32, i32, i32) {
    %c0_i32 = arith.constant 0 : i32
    %c0_i32_0 = arith.constant 0 : i32
    %c0_i32_1 = arith.constant 0 : i32
    %c0_i32_2 = arith.constant 0 : i32
    return %c0_i32, %c0_i32_0, %c0_i32_1 : i32, i32, i32
  }
  func.func @transform_7(%arg0: i32) -> (i32, i32, i32) {
    %c0_i32 = arith.constant 0 : i32
    %c0_i32_0 = arith.constant 0 : i32
    %c0_i32_1 = arith.constant 0 : i32
    %c0_i32_2 = arith.constant 0 : i32
    return %c0_i32, %c0_i32_0, %c0_i32_1 : i32, i32, i32
  }
  func.func @transform_8(%arg0: i32) -> (i32, i32, i32) {
    %c0_i32 = arith.constant 0 : i32
    %c0_i32_0 = arith.constant 0 : i32
    %c0_i32_1 = arith.constant 0 : i32
    %c0_i32_2 = arith.constant 0 : i32
    return %c0_i32, %c0_i32_0, %c0_i32_1 : i32, i32, i32
  }
  func.func @transform_9(%arg0: i32) -> (i32, i32, i32) {
    %c0_i32 = arith.constant 0 : i32
    %c0_i32_0 = arith.constant 0 : i32
    %c0_i32_1 = arith.constant 0 : i32
    %c0_i32_2 = arith.constant 0 : i32
    return %c0_i32, %c0_i32_0, %c0_i32_1 : i32, i32, i32
  }
  func.func @transform_10(%arg0: i32) -> (i32, i32, i32) {
    %c0_i32 = arith.constant 0 : i32
    %c0_i32_0 = arith.constant 0 : i32
    %c0_i32_1 = arith.constant 0 : i32
    %c0_i32_2 = arith.constant 0 : i32
    return %c0_i32, %c0_i32_0, %c0_i32_1 : i32, i32, i32
  }
  func.func @transform_11(%arg0: i32) -> (i32, i32, i32) {
    %c0_i32 = arith.constant 0 : i32
    %c0_i32_0 = arith.constant 0 : i32
    %c0_i32_1 = arith.constant 0 : i32
    %c0_i32_2 = arith.constant 0 : i32
    return %c0_i32, %c0_i32_0, %c0_i32_1 : i32, i32, i32
  }
  func.func @transform_12(%arg0: i32) -> (i32, i32, i32) {
    %c0_i32 = arith.constant 0 : i32
    %c0_i32_0 = arith.constant 0 : i32
    %c0_i32_1 = arith.constant 0 : i32
    return %arg0, %c0_i32, %c0_i32_0 : i32, i32, i32
  }
}

</mosaic_0001>

<bundles_post_ra>
// kernel: tpu_custom_call.1
= control target key start
LH: loop header
LB: loop body
LE: loop exit
PB: predicated region body
PF: predicated region fallthrough
CT: control target
= control target key end

     0   :  { %s4604_s0 = inlined_call_operand.vmem [shape: bf16[2,8,4], index: 0, kind: input, shape index: {}]   ;;  %s4605_s1 = inlined_call_operand.vmem [shape: bf16[2,8,128], index: 1, kind: input, shape index: {}]   ;;  %s4606_s2 = inlined_call_operand.vmem [shape: f32[2,8,1], index: 2, kind: input, shape index: {}]   ;;  %s4607_s3 = inlined_call_operand.vmem [shape: s32[8,1], index: 3, kind: input, shape index: {}]   ;;  %s4608_s4 = inlined_call_operand.vmem [shape: bf16[4,128], index: 4, kind: input, shape index: {}]   ;;  %s4609_s5 = inlined_call_operand.vmem [shape: f32[1,128], index: 5, kind: input, shape index: {}]   ;;  %s4610_s6 = inlined_call_operand.hbm [shape: bf16[3,384,128], index: 6, kind: input, shape index: {}]   ;;  %s4611_s7 = inlined_call_operand.vmem [shape: f32[3,1,128], index: 7, kind: input, shape index: {}]   ;;  %s4612_s8 = inlined_call_operand.hbm [shape: bf16[3,384,128], index: 8, kind: input, shape index: {}]   ;;  %s4613_s9 = inlined_call_operand.vmem [shape: f32[3,1,128], index: 9, kind: input, shape index: {}]   ;;  %s4614_s10 = inlined_call_operand.hbm [shape: bf16[3,128,128], index: 10, kind: input, shape index: {}]   ;;  %s4615_s11 = inlined_call_operand.vmem [shape: f32[3,1,128], index: 11, kind: input, shape index: {}]   ;;  %s4616_s12 = inlined_call_operand.hbm [shape: f32[2,8,128], index: 12, kind: output, shape index: {}]  }
   0x1   :  { %4629 = sst [smem:[#allocation19_spill]] %s4616_s12 }
   0x2   :  { %17 = vsyncpa [#allocation3], 0 }
   0x3   :  { %18 = vsyncpa [#allocation6], 0 }
   0x4   :  { %19 = vsyncpa [#allocation4], 0 }
   0x5   :  { %21 = vsyncpa [#allocation4 + $0x1], 0  ;;  %s4112_s21 = smov 0   ;;  %s4114_s22 = smov 0  }
   0x6   :  { %s4116_s23 = smov 0   ;;  %s4118_s24 = smov 0  }
   0x7 LB: > { %4630 = sst [smem:[#allocation12_spill]] %s4024_s21  ;;  %s4133_s25 = sadd.s32 4294967295, %s4036_s24   ;;  %s4036_s24 = sphi %s4118_s24, %s4655_s24   ;;  %s4032_s23 = sphi %s4116_s23, %s4657_s23   ;;  %s4028_s22 = sphi %s4114_s22, %s4659_s22   ;;  %s4024_s21 = sphi %s4112_s21, %s4658_s21  }
   0x8   : > { %4631 = sst [smem:[#allocation13_spill]] %s4032_s23  ;;  %s2878_s26 = sadd.s32 4294967294, %s4036_s24  }
   0x9   : > { %4632 = sst [smem:[#allocation14_spill]] %s4036_s24  ;;  %s4137_s27 = sadd.s32 1, %s4036_s24  }
   0xa   : > { %4633 = sst [smem:[#allocation15_spill]] %s4137_s27  ;;  %s301_s28 = sadd.s32 1, %s4032_s23 }
   0xb   : > { %s298_s29 = ssub.s32 %s4036_s24, %s4137_s27  ;;  %p311_p0 = scmp.ne.s32.totalorder %s4032_s23, %s4028_s22 }
   0xc   : > { %p299_p1 = scmp.eq.s32.totalorder %s298_s29, 0  ;;  %p312_p2 = scmp.eq.s32.totalorder %s4133_s25, 1 }
   0xd   : > { %p317_p3 = scmp.ne.s32.totalorder %s4028_s22, %s4024_s21  ;;  %p318_p4 = scmp.eq.s32.totalorder %s2878_s26, 1 }
   0xe   : > { %s4148_s30 = scalar_select %p299_p1, %s4032_s23, %s301_s28  }
   0xf   : > { %p4150_p5 = por %p312_p2, %p311_p0  ;;  %p4154_p6 = por %p318_p4, %p317_p3 }
  0x10   : > { %4634 = sst [smem:[#allocation16_spill]] %s4148_s30  ;;  %p2879_p7 = scmp.ge.s32.totalorder %s4036_s24, 1 }
  0x11   : > { %s4635_s13 = scalar_select %p4150_p5, 1, 0 }
  0x12   : > { %s4637_s14 = scalar_select %p4154_p6, 1, 0 }
  0x13   : > { %4636 = sst [smem:[#allocation17_spill]] %s4635_s13  ;;  %p325_p8 = scmp.lt.s32.totalorder %s4036_s24, 3 }
  0x14   : > { %4638 = sst [smem:[#allocation18_spill]] %s4637_s14  ;;  %p4621_p9 = scmp.eq.s32.totalorder %s4133_s25, 0 }
  0x15   : > { %p4161_p10 = pnand %p2879_p7, %p325_p8  ;;  %s4038_s16 = smov [#allocation5]  }
  0x16   : > { %s362_s17 = sshll.u32 %s4038_s16, 4  ;;  %s4039_s19 = smov [#allocation2]   ;;  %s4167_s17 = int_to_ptr.vmem [resolvable:$true] %s362_s17 }
  0x17   : > { %s4639_s15 = scalar_select %p4161_p10, 1, 0 }
  0x18   : > { %p3655_p11 = pneg %p4161_p10  ;;  %s346_s20 = sshll.u32 %s4039_s19, 4  ;;  %s4175_s20 = int_to_ptr.vmem [resolvable:$true] %s346_s20 }
  0x19   : > { %s4040_s26 = smov [#allocation7]   ;;  %s3882_s23 = scalar_lea.hbm %s4612_s8, 9216 }
  0x1a   : > { %p4171_p12 = pnand %p4621_p9, %p3655_p11  ;;  %s4177_s28 = sshll.u32 %s4040_s26, 4  ;;  %s379_s28 = int_to_ptr.vmem [resolvable:$true] %s4177_s28 }
  0x1b   : > { %p3883_p13 = scmp.ne.s32.totalorder %s4612_s8, %s3882_s23  ;;  %p3889_p3 = scmp.lt.u32.totalorder %s3882_s23, %s4612_s8 }
  0x1c   : > { %p4187_p0 = pneg %p4171_p12 }
  0x1e   : > { %p3885_p1 = pnand %p4187_p0, %p3883_p13 }
  0x20   : > { %p3886_p2 = pneg %p3885_p1 }
  0x22   : > { %p3891_p4 = pnand %p3889_p3, %p3886_p2 }
  0x24   : > { %3894 = shalt.err (!%p3891_p4)
}
  0x25   : > { %s3895_s27 = scalar_lea.vmem %s4167_s17, 9216  ;;  %p3903_p9 = scmp.lt.s32.totalorder %s4167_s17, %s4167_s17 }
  0x26   : > { %p3896_p7 = scmp.ne.s32.totalorder %s4167_s17, %s3895_s27  ;;  %p3904_p6 = scmp.lt.s32.totalorder %s3895_s27, %s3895_s27 }
  0x28   : > { %p3898_p8 = pnand %p3896_p7, %p4187_p0  ;;  %p3905_p13 = por %p3904_p6, %p3903_p9 }
  0x2a   : > { %p3899_p11 = pneg %p3898_p8 }
  0x2c   : > { %p3906_p1 = pnand %p3905_p13, %p3899_p11 }
  0x2e   : > { %3909 = shalt.err (!%p3906_p1)
}
  0x2f   : > { %s4041_s30 = smov 64   ;;  %s4042_s23 = smov 4  }
  0x30   : > { %3661 = dma.hbm_to_vmem [thread:$0]  (!%p4171_p12), %s4612_s8, 9216, %s4167_s17, [#allocation6], %s4041_s30, %s4041_s30, %s4042_s23  }
  0x31   : > { %s3910_s27 = scalar_lea.hbm %s4610_s6, 9216 }
  0x32   : > { %p3911_p6 = scmp.ne.s32.totalorder %s4610_s6, %s3910_s27  ;;  %p3917_p3 = scmp.lt.u32.totalorder %s3910_s27, %s4610_s6 }
  0x34   : > { %p3913_p9 = pnand %p3911_p6, %p4187_p0 }
  0x36   : > { %p3914_p2 = pneg %p3913_p9 }
  0x38   : > { %p3919_p4 = pnand %p3917_p3, %p3914_p2 }
  0x3a   : > { %3922 = shalt.err (!%p3919_p4)
}
  0x3b   : > { %s3923_s17 = scalar_lea.vmem %s4175_s20, 9216  ;;  %p3931_p13 = scmp.lt.s32.totalorder %s4175_s20, %s4175_s20 }
  0x3c   : > { %p3924_p7 = scmp.ne.s32.totalorder %s4175_s20, %s3923_s17  ;;  %p3932_p1 = scmp.lt.s32.totalorder %s3923_s17, %s3923_s17 }
  0x3e   : > { %p3926_p8 = pnand %p3924_p7, %p4187_p0  ;;  %p3933_p6 = por %p3932_p1, %p3931_p13 }
  0x40   : > { %p3927_p11 = pneg %p3926_p8 }
  0x42   : > { %p3934_p9 = pnand %p3933_p6, %p3927_p11 }
  0x44   : > { %3937 = shalt.err (!%p3934_p9)
}
  0x45   : > { %3658 = dma.hbm_to_vmem [thread:$0]  (!%p4171_p12), %s4610_s6, 9216, %s4175_s20, [#allocation3], %s4041_s30, %s4041_s30, %s4042_s23  }
  0x46   : > { %s3938_s29 = scalar_lea.hbm %s4614_s10, 3072 }
  0x47   : > { %p3939_p2 = scmp.ne.s32.totalorder %s4614_s10, %s3938_s29  ;;  %p3945_p7 = scmp.lt.u32.totalorder %s3938_s29, %s4614_s10 }
  0x49   : > { %p3941_p3 = pnand %p3939_p2, %p4187_p0 }
  0x4b   : > { %p3942_p4 = pneg %p3941_p3 }
  0x4d   : > { %p3947_p8 = pnand %p3945_p7, %p3942_p4 }
  0x4f   : > { %3950 = shalt.err (!%p3947_p8)
}
  0x50   : > { %s3951_s17 = scalar_lea.vmem %s379_s28, 3072  ;;  %p3959_p6 = scmp.lt.s32.totalorder %s379_s28, %s379_s28 }
  0x51   : > { %p3952_p11 = scmp.ne.s32.totalorder %s379_s28, %s3951_s17  ;;  %p3960_p9 = scmp.lt.s32.totalorder %s3951_s17, %s3951_s17 }
  0x53   : > { %p3954_p13 = pnand %p3952_p11, %p4187_p0  ;;  %p3961_p5 = por %p3960_p9, %p3959_p6 }
  0x55   : > { %p3955_p1 = pneg %p3954_p13 }
  0x57   : > { %p3962_p10 = pnand %p3961_p5, %p3955_p1 }
  0x59   : > { %3965 = shalt.err (!%p3962_p10)
}
  0x5a   : > { %3664 = dma.hbm_to_vmem [thread:$0]  (!%p4171_p12), %s4614_s10, 3072, %s379_s28, [#allocation6], %s4041_s30, %s4041_s30, %s4042_s23  }
  0x5b   : > { %p4642_p2 = scmp.ne.s32.totalorder %s4639_s15, 0 }
  0x5c   : > { %p4643_p0 = scmp.eq.s32.totalorder (!%p4642_p2), %s4133_s25, 0 }
  0x5d   : > { %418 = sbr.rel (%p4642_p2) target bundleno = 2043 (0x7fb), region = 68 }
  0x64   : > { %4011 = dma.done.wait (%p4643_p0), [#allocation3], 9216   ;;  %p4644_p3 = pmov %p4643_p0 }
  0x65   : > { %p4645_p5 = pmov %p4643_p0 }
  0x66   : > { %4013 = vsyncadd (%p4644_p3), [#allocation3], 4294958080 }
  0x67   : > { %4015 = dma.done.wait (%p4645_p5), [#allocation6], 12288   ;;  %p4646_p10 = pmov %p4643_p0 }
  0x68   : > { %p475_p4 = scmp.lt.s32.totalorder %s4133_s25, 1  ;;  %v4043_v0 = vmov 0.0   ;;  %vm4044_vm0 = vmmov 0   ;;  %v4045_v1 = vmov 0   ;;  %vm504_vm1 = vcmask 1041408   ;;  %v555_v6 = vld [vmem:[%s4607_s3] sm:$0xff] }
  0x69   : > { %4017 = vsyncadd (%p4646_p10), [#allocation6], 4294955008  ;;  %3241 = vmatprep.subr.bf16.mxu0 %v4043_v0  ;;  %3243 = vmatprep.mubr.msk.bf16.mxu0 %vm4044_vm0, %v4043_v0  ;;  %v489_v2 = vld [vmem:[%s4608_s4] sm:$0x3]  ;;  %vm500_vm2 = vcmask 31744   ;;  %vm556_vm3 = vcmp.ge.s32.totalorder %v555_v6, 1 }
  0x6a   : > { %s4274_s14 = scalar_select %p475_p4, %s4133_s25, 1  ;;  %3716 = vset.pattern.permute.xlu0 %v4045_v1  ;;  %3717 = vset.pattern.permute.xlu1 %v4045_v1  ;;  %v506_v5 = vsel %vm504_vm1, %v489_v2, 0  ;;  %vm565_vm4 = vcmp.lt.s32.totalorder %v555_v6, 6  ;;  %vm559_vm5 = vcmp.lt.s32.totalorder %v555_v6, 7  ;;  %v2894_v7 = vsel %vm556_vm3, 1.0, %v4043_v0  ;;  %v3718_v13 = vld [vmem:[#allocation2 + $0x40] sm:$0xff]  }
  0x6b   : > { %3287 = vmatprep.subr.bf16.mxu1 %v4043_v0  ;;  %3303 = vmatprep.mubr.msk.bf16.mxu1 %vm4044_vm0, %v4043_v0  ;;  %vm571_vm6 = vcmp.lt.s32.totalorder %v555_v6, 4  ;;  %v2895_v8 = vsel %vm559_vm5, 1.0, %v4043_v0  ;;  %v2897_v9 = vsel %vm565_vm4, 1.0, %v4043_v0  ;;  %vm562_vm7 = vcmp.ge.s32.totalorder %v555_v6, 2  ;;  %v3719_v14 = vld [vmem:[#allocation2 + $0x48] sm:$0xff]   ;;  %v3720_v15 = vld [vmem:[#allocation2 + $0x80] sm:$0xff]  }
  0x6c   : > { %s2889_s15 = sshll.u32 %s4274_s14, 2  ;;  %s2891_s18 = sshll.u32 %s4274_s14, 3  ;;  %3242 = vmatpush3.bf16.msra.mxu0 %v506_v5  ;;  %595 = vperm.xlu1 %3717, %v2895_v8   ;;  %v2896_v10 = vsel %vm562_vm7, 1.0, %v4043_v0  ;;  %vm568_vm8 = vcmp.ge.s32.totalorder %v555_v6, 4  ;;  %v2899_v11 = vsel %vm571_vm6, 1.0, %v4043_v0  ;;  %v3721_v16 = vld [vmem:[#allocation2 + $0x50] sm:$0xff]  }
  0x6d   : > { %s478_s23 = scalar_lea.vmem %s4604_s0, %s2889_s15  ;;  %s486_s13 = scalar_lea.vmem %s4606_s2, %s2891_s18  ;;  %3247 = vmatprep.subr.bf16.mxu0 %v4043_v0  ;;  %v2898_v12 = vsel %vm568_vm8, 1.0, %v4043_v0  ;;  %3288 = vmatpush3.bf16.msra.mxu1 %v3720_v15  ;;  %v3722_v17 = vld [vmem:[#allocation2 + $0x88] sm:$0xff]   ;;  %v3723_v18 = vld [vmem:[#allocation2 + $0x58] sm:$0xff]   ;;  %v3724_v19 = vld [vmem:[#allocation2 + $0x90] sm:$0xff]  }
  0x6e   : > { %v488_v3 = vld [vmem:[%s478_s23] sm:$0xf]  ;;  %3289 = vmatprep.subr.bf16.mxu1 %v4043_v0  ;;  %v3726_v21 = vld [vmem:[#allocation2 + $0x98] sm:$0xff]   ;;  %v3727_v22 = vld [vmem:[#allocation2 + $0x68] sm:$0xff]   ;;  %s482_s20 = scalar_lea.vmem %s4605_s1, %s2889_s15  ;;  %s472_s19 = sand.u32 1, %s4028_s22  }
  0x6f   : > { %v492_v4 = vld [vmem:[%s486_s13] sm:$0xff]  ;;  %3244 = vmatmul.mubr.msk.bf16.vlgmr.msra.gmra.mrb[0].mxu0 %vm500_vm2, %v488_v3  ;;  %v3729_v24 = vld [vmem:[#allocation2 + $0x70] sm:$0xff]   ;;  %v3730_v25 = vld [vmem:[#allocation2 + $0xa8] sm:$0xff]   ;;  %s2888_s26 = sshll.u32 %s472_s19, 3  ;;  %s4647_s18 = sld [smem:[#allocation17_spill]] }
  0x70   : > { %551 = vperm.xlu0 %3716, %v492_v4   ;;  %3263 = vmatprep.mubr.msk.bf16.mxu0 %vm4044_vm0, %v4043_v0  ;;  %v3725_v20 = vld [vmem:[#allocation2 + $0x60] sm:$0xff]   ;;  %v3731_v26 = vld [vmem:[#allocation2 + $0x78] sm:$0xff]   ;;  %v3732_v27 = vld [vmem:[#allocation2 + $0xb0] sm:$0xff]   ;;  %s3065_s14 = sshll.u32 %s4133_s25, 7  ;;  %s474_s15 = scalar_lea.vmem [#allocation8], %s2888_s26 }
  0x71   : > { %1272 = vperm.xlu1 %3717, %v2896_v10   ;;  %3248 = vmatpush3.bf16.msra.mxu0 %v3718_v13  ;;  %v3728_v23 = vld [vmem:[#allocation2 + $0xa0] sm:$0xff]   ;;  %v3734_v28 = vld [vmem:[#allocation2 + $0xb8] sm:$0xff]   ;;  %v3735_v54 = vld [vmem:[#allocation2 + $0x8] sm:$0xff]   ;;  %s2764_s28 = sshll.u32 %s474_s15, 4  ;;  %s4648_s21 = sld [smem:[#allocation19_spill]]  ;;  %s4564_s28 = int_to_ptr.vmem [resolvable:$true] %s2764_s28 }
  0x72   : > { %3249 = vmatprep.subr.bf16.mxu0 %v4043_v0  ;;  %3290 = vmatpush3.bf16.msra.mxu1 %v3722_v17  ;;  %v490_v29 = vld [vmem:[%s482_s20] sm:$0xf]  ;;  %v3736_v56 = vld [vmem:[#allocation2 + $0x10] sm:$0xff]   ;;  %v3737_v57 = vld [vmem:[#allocation2 + $0x18] sm:$0xff]   ;;  %s2751_s29 = scalar_lea.sflag [#allocation4], %s472_s19  ;;  %s3966_s25 = scalar_lea.vmem %s4564_s28, 128 }
  0x73   : > { %3291 = vmatprep.subr.bf16.mxu1 %v4043_v0  ;;  %v2892_v30 = vld [vmem:[%s4609_s5] ss:$0 sm:$0xff]  ;;  %v491_v31 = vunpack.c.l.bf16 %v490_v29  ;;  %v3739_v59 = vld [vmem:[#allocation2 + $0x28] sm:$0xff]   ;;  %v3740_v60 = vld [vmem:[#allocation2 + $0x30] sm:$0xff]   ;;  %p3967_p12 = scmp.ne.s32.totalorder %s4564_s28, %s3966_s25  ;;  %s4046_s16 = smov [#allocation8]  }
  0x74   : > { %587 = vperm.xlu0 %3716, %v2894_v7   ;;  %v3733_v50 = vld [vmem:[#allocation2] sm:$0xff]   ;;  %v3741_v63 = vld [vmem:[#allocation2 + $0x38] sm:$0xff]   ;;  %v3743_v4 = vld [vmem:[#allocation5 + $0x48] sm:$0xff]   ;;  %s3970_s26 = sshll.u32 %s4046_s16, 4  ;;  %s3971_s26 = int_to_ptr.vmem [resolvable:$false] %s3970_s26 }
  0x75   : > { %2075 = vperm.xlu1 %3717, %v2898_v12   ;;  %3250 = vmatpush3.bf16.msra.mxu0 %v3719_v14  ;;  %v3738_v58 = vld [vmem:[#allocation2 + $0x20] sm:$0xff]   ;;  %v3745_v6 = vld [vmem:[#allocation5 + $0x50] sm:$0xff]   ;;  %v3746_v7 = vld [vmem:[#allocation5 + $0x8] sm:$0xff]   ;;  %p4650_p7 = scmp.ne.s32.totalorder %s4647_s18, 0  ;;  %s3972_s27 = scalar_lea.vmem %s3971_s26, 256 }
  0x76   : > { %3251 = vmatprep.subr.bf16.mxu0 %v4043_v0  ;;  %3292 = vmatpush3.bf16.msra.mxu1 %v3724_v19  ;;  %v3742_v3 = vld [vmem:[#allocation5 + $0x40] sm:$0xff]   ;;  %v3747_v8 = vld [vmem:[#allocation5 + $0x58] sm:$0xff]   ;;  %v3751_v12 = vld [vmem:[#allocation5 + $0x68] sm:$0xff]   ;;  %p3973_p13 = scmp.lt.s32.totalorder %s4564_s28, %s3971_s26  ;;  %p3974_p1 = scmp.lt.s32.totalorder %s3972_s27, %s3966_s25 }
  0x77   : > { %3293 = vmatprep.subr.bf16.mxu1 %v4043_v0  ;;  %v3744_v5 = vld [vmem:[#allocation5] sm:$0xff]   ;;  %v3753_v14 = vld [vmem:[#allocation5 + $0x70] sm:$0xff]   ;;  %v3754_v15 = vld [vmem:[#allocation5 + $0x28] sm:$0xff]   ;;  %s4649_s13 = smov %s4648_s21  ;;  %s4562_s24 = scalar_lea.hbm %s4648_s21, %s3065_s14 }
  0x78   : > { %1280 = vperm.xlu0 %3716, %v2897_v9   ;;  %v3748_v9 = vld [vmem:[#allocation5 + $0x10] sm:$0xff]   ;;  %v3749_v10 = vld [vmem:[#allocation5 + $0x60] sm:$0xff]   ;;  %p3968_p8 = pnand %p3967_p12, %p4650_p7  ;;  %p3975_p6 = por %p3974_p1, %p3973_p13 }
  0x79   : > { %3252 = vmatpush3.bf16.msra.mxu0 %v3721_v16  ;;  %v3752_v13 = vld [vmem:[#allocation5 + $0x20] sm:$0xff]   ;;  %v3755_v16 = vld [vmem:[#allocation5 + $0x78] sm:$0xff]   ;;  %v3756_v17 = vld [vmem:[#allocation5 + $0x30] sm:$0xff]  }
  0x7a   : > { %3253 = vmatprep.subr.bf16.mxu0 %v4043_v0  ;;  %3294 = vmatpush3.bf16.msra.mxu1 %v3726_v21  ;;  %p3969_p11 = pneg %p3968_p8 }
  0x7b   : > { %3295 = vmatprep.subr.bf16.mxu1 %v4043_v0 }
  0x7c   : > { %2082 = vperm.xlu0 %3716, %v2899_v11   ;;  %v3750_v11 = vld [vmem:[#allocation5 + $0x18] sm:$0xff]   ;;  %p3976_p9 = pnand %p3975_p6, %p3969_p11 }
  0x7d   : > { %3254 = vmatpush3.bf16.msra.mxu0 %v3723_v18  ;;  %v3758_v18 = vld [vmem:[#allocation5 + $0x38] sm:$0xff]  }
  0x7e   : > { %3255 = vmatprep.subr.bf16.mxu0 %v4043_v0  ;;  %3296 = vmatpush3.bf16.msra.mxu1 %v3728_v23 }
  0x7f   : > { %3297 = vmatprep.subr.bf16.mxu1 %v4043_v0 }
  0x81   : > { %3256 = vmatpush3.bf16.msra.mxu0 %v3725_v20 }
  0x82   : > { %3257 = vmatprep.subr.bf16.mxu0 %v4043_v0  ;;  %3298 = vmatpush3.bf16.msra.mxu1 %v3730_v25 }
  0x83   : > { %3299 = vmatprep.subr.bf16.mxu1 %v4043_v0 }
  0x85   : > { %3258 = vmatpush3.bf16.msra.mxu0 %v3727_v22 }
  0x86   : > { %3259 = vmatprep.subr.bf16.mxu0 %v4043_v0  ;;  %3300 = vmatpush3.bf16.msra.mxu1 %v3732_v27 }
  0x87   : > { %3301 = vmatprep.subr.bf16.mxu1 %v4043_v0 }
  0x89   : > { %3260 = vmatpush3.bf16.msra.mxu0 %v3729_v24 }
  0x8a   : > { %3261 = vmatprep.subr.bf16.mxu0 %v4043_v0  ;;  %3302 = vmatpush3.bf16.msra.mxu1 %v3734_v28 }
  0x8b   : > { %3327 = vmatprep.subr.bf16.mxu1 %v4043_v0 }
  0x8d   : > { %3262 = vmatpush3.bf16.msra.mxu0 %v3731_v26 }
  0x8e   : > { %3267 = vmatprep.subr.bf16.mxu0 %v4043_v0 }
  0xeb   : > { %v4335_v49 = vpop.permute.xlu1 %595 }
  0xef   : > { %v552_v38 = vpop.permute.xlu0 %551 }
  0xf3   : > { %v4348_v62 = vpop.permute.xlu0 %587 }
 0x142   : > { %v542_v32 = vpop.f32.mrb[0].mxu0 }
 0x143   : > { %v543_v33 = vadd.f32 %v2892_v30, %v542_v32  ;;  %v3245_v34 = vpop.f32.mrb[1].mxu0  ;;  %v2924_v30 = vld [vmem:[%s4611_s7] ss:$0 sm:$0xff] }
 0x144   : > { %v545_v35 = vpop.f32.mrb[2].mxu0 }
 0x145   : > { %v548_v36 = vadd.f32 %v543_v33, %v491_v31  ;;  %v3246_v37 = vpop.f32.mrb[3].mxu0 }
 0x147   : > { %v4328_v39 = vmul.f32 %v552_v38, %v548_v36 }
 0x149   : > { %v574_v40 = vmul.f32 %v4328_v39, %v4328_v39 }
 0x14b   : > { %v575_v41 = vmul.f32 %v574_v40, %v4328_v39 }
 0x14d   : > { %v576_v42 = vmul.f32 0.044715, %v575_v41 }
 0x14f   : > { %v577_v43 = vadd.f32 %v576_v42, %v4328_v39 }
 0x151   : > { %v578_v44 = vmul.f32 0.7978846, %v577_v43 }
 0x153   : > { %3870 = vtanh.f32 %v578_v44 }
 0x15d   : > { %v3871_v45 = vpop.eup %3870 }
 0x15e   : > { %v580_v46 = vadd.f32 1.0, %v3871_v45  ;;  %v3757_v45 = vld [vmem:[#allocation5 + $0x80] sm:$0xff]  }
 0x160   : > { %v581_v47 = vmul.f32 0.5, %v580_v46 }
 0x162   : > { %v582_v48 = vmul.f32 %v581_v47, %v4328_v39 }
 0x164   : > { %v592_v51 = vrot.slane %v582_v48, 1  ;;  %v583_v52 = vpack.c.bf16 %v582_v48, %v582_v48  ;;  %v584_v61 = vrot.slane %v582_v48, 7 }
 0x166   : > { %v598_v53 = vmul.f32 %v4335_v49, %v592_v51  ;;  %3264 = vmatmul.mubr.bf16.vlgmr.msra.gmra.mrb[4].mxu0 %v583_v52  ;;  %v590_v1 = vmul.f32 %v4348_v62, %v584_v61  ;;  %v3760_v52 = vld [vmem:[#allocation5 + $0x90] sm:$0xff]   ;;  %v3766_v61 = vld [vmem:[#allocation2 + $0x100] sm:$0xff]  }
 0x167   : > { %3268 = vmatpush3.bf16.msra.mxu0 %v3733_v50  ;;  %3283 = vmatprep.mubr.msk.bf16.mxu0 %vm4044_vm0, %v4043_v0  ;;  %v3759_v50 = vld [vmem:[#allocation5 + $0x88] sm:$0xff]  }
 0x168   : > { %v599_v55 = vpack.c.bf16 %v598_v53, %v598_v53  ;;  %3269 = vmatprep.subr.bf16.mxu0 %v4043_v0  ;;  %v591_v2 = vpack.c.bf16 %v590_v1, %v590_v1  ;;  %v3761_v53 = vld [vmem:[#allocation5 + $0x98] sm:$0xff]   ;;  %v3769_v1 = vld [vmem:[#allocation2 + $0x110] sm:$0xff]  }
 0x16a   : > { %3304 = vmatmul.mubr.bf16.vlgmr.msra.gmra.mrb[0].mxu1 %v599_v55  ;;  %v3763_v55 = vld [vmem:[#allocation5 + $0xa8] sm:$0xff]  }
 0x16b   : > { %3270 = vmatpush3.bf16.msra.mxu0 %v3735_v54  ;;  %3343 = vmatprep.mubr.msk.bf16.mxu1 %vm4044_vm0, %v4043_v0  ;;  %v3762_v54 = vld [vmem:[#allocation5 + $0xa0] sm:$0xff]  }
 0x16c   : > { %3271 = vmatprep.subr.bf16.mxu0 %v4043_v0  ;;  %3328 = vmatpush3.bf16.msra.mxu1 %v3744_v5  ;;  %v3774_v5 = vld [vmem:[#allocation2 + $0xd8] sm:$0xff]  }
 0x16d   : > { %3329 = vmatprep.subr.bf16.mxu1 %v4043_v0 }
 0x16f   : > { %3272 = vmatpush3.bf16.msra.mxu0 %v3736_v56  ;;  %v3764_v56 = vld [vmem:[#allocation5 + $0xb0] sm:$0xff]  }
 0x170   : > { %3273 = vmatprep.subr.bf16.mxu0 %v4043_v0  ;;  %3330 = vmatpush3.bf16.msra.mxu1 %v3746_v7  ;;  %v3776_v7 = vld [vmem:[#allocation2 + $0xe0] sm:$0xff]  }
 0x171   : > { %3331 = vmatprep.subr.bf16.mxu1 %v4043_v0 }
 0x173   : > { %3274 = vmatpush3.bf16.msra.mxu0 %v3737_v57 }
 0x174   : > { %3275 = vmatprep.subr.bf16.mxu0 %v4043_v0  ;;  %3332 = vmatpush3.bf16.msra.mxu1 %v3748_v9  ;;  %v3778_v9 = vld [vmem:[#allocation2 + $0xe8] sm:$0xff]  }
 0x175   : > { %3333 = vmatprep.subr.bf16.mxu1 %v4043_v0 }
 0x177   : > { %3276 = vmatpush3.bf16.msra.mxu0 %v3738_v58  ;;  %v3765_v58 = vld [vmem:[#allocation5 + $0xb8] sm:$0xff]  }
 0x178   : > { %3277 = vmatprep.subr.bf16.mxu0 %v4043_v0  ;;  %3334 = vmatpush3.bf16.msra.mxu1 %v3750_v11  ;;  %v3780_v11 = vld [vmem:[#allocation2 + $0xf0] sm:$0xff]  }
 0x179   : > { %3335 = vmatprep.subr.bf16.mxu1 %v4043_v0 }
 0x17b   : > { %3278 = vmatpush3.bf16.msra.mxu0 %v3739_v59 }
 0x17c   : > { %3279 = vmatprep.subr.bf16.mxu0 %v4043_v0  ;;  %3336 = vmatpush3.bf16.msra.mxu1 %v3752_v13 }
 0x17d   : > { %3337 = vmatprep.subr.bf16.mxu1 %v4043_v0 }
 0x17f   : > { %3280 = vmatpush3.bf16.msra.mxu0 %v3740_v60 }
 0x180   : > { %3281 = vmatprep.subr.bf16.mxu0 %v4043_v0  ;;  %3338 = vmatpush3.bf16.msra.mxu1 %v3754_v15 }
 0x181   : > { %3339 = vmatprep.subr.bf16.mxu1 %v4043_v0 }
 0x183   : > { %3282 = vmatpush3.bf16.msra.mxu0 %v3741_v63  ;;  %v3768_v63 = vld [vmem:[#allocation2 + $0xc0] sm:$0xff]  }
 0x184   : > { %3307 = vmatprep.subr.bf16.mxu0 %v4043_v0  ;;  %3340 = vmatpush3.bf16.msra.mxu1 %v3756_v17 }
 0x185   : > { %3341 = vmatprep.subr.bf16.mxu1 %v4043_v0 }
 0x186   : > { %3284 = vmatmul.mubr.bf16.vlgmr.msra.gmra.mrb[8].mxu0 %v591_v2  ;;  %v3771_v2 = vld [vmem:[#allocation2 + $0x118] sm:$0xff]  }
 0x187   : > { %3323 = vmatprep.mubr.msk.bf16.mxu0 %vm4044_vm0, %v4043_v0  ;;  %3308 = vmatpush3.bf16.msra.mxu0 %v3742_v3  ;;  %v3772_v3 = vld [vmem:[#allocation2 + $0xd0] sm:$0xff]  }
 0x188   : > { %3309 = vmatprep.subr.bf16.mxu0 %v4043_v0  ;;  %3342 = vmatpush3.bf16.msra.mxu1 %v3758_v18 }
 0x189   : > { %3367 = vmatprep.subr.bf16.mxu1 %v4043_v0 }
 0x18b   : > { %3310 = vmatpush3.bf16.msra.mxu0 %v3743_v4  ;;  %v3773_v4 = vld [vmem:[#allocation2 + $0x120] sm:$0xff]  }
 0x18c   : > { %3311 = vmatprep.subr.bf16.mxu0 %v4043_v0 }
 0x18f   : > { %3312 = vmatpush3.bf16.msra.mxu0 %v3745_v6  ;;  %v3775_v6 = vld [vmem:[#allocation2 + $0x128] sm:$0xff]  }
 0x190   : > { %3313 = vmatprep.subr.bf16.mxu0 %v4043_v0 }
 0x193   : > { %3314 = vmatpush3.bf16.msra.mxu0 %v3747_v8  ;;  %v3777_v8 = vld [vmem:[#allocation2 + $0x130] sm:$0xff]  }
 0x194   : > { %3315 = vmatprep.subr.bf16.mxu0 %v4043_v0 }
 0x197   : > { %3316 = vmatpush3.bf16.msra.mxu0 %v3749_v10  ;;  %v3779_v10 = vld [vmem:[#allocation2 + $0x138] sm:$0xff]  }
 0x198   : > { %3317 = vmatprep.subr.bf16.mxu0 %v4043_v0 }
 0x19b   : > { %3318 = vmatpush3.bf16.msra.mxu0 %v3751_v12  ;;  %v3782_v12 = vld [vmem:[#allocation2 + $0xf8] sm:$0xff]  }
 0x19c   : > { %3319 = vmatprep.subr.bf16.mxu0 %v4043_v0 }
 0x19f   : > { %3320 = vmatpush3.bf16.msra.mxu0 %v3753_v14 }
 0x1a0   : > { %3321 = vmatprep.subr.bf16.mxu0 %v4043_v0 }
 0x1a3   : > { %3322 = vmatpush3.bf16.msra.mxu0 %v3755_v16 }
 0x1a4   : > { %3347 = vmatprep.subr.bf16.mxu0 %v4043_v0 }
 0x239   : > { %v714_v19 = vpop.f32.mrb[4].mxu0 }
 0x23a   : > { %v3265_v20 = vpop.f32.mrb[5].mxu0 }
 0x23b   : > { %v717_v21 = vpop.f32.mrb[6].mxu0 }
 0x23c   : > { %v3266_v22 = vpop.f32.mrb[7].mxu0 }
 0x23d   : > { %v906_v23 = vpop.f32.mrb[0].mxu1 }
 0x23e   : > { %v3305_v24 = vpop.f32.mrb[1].mxu1 }
 0x23f   : > { %v909_v25 = vpop.f32.mrb[2].mxu1 }
 0x240   : > { %v3306_v26 = vpop.f32.mrb[3].mxu1 }
 0x259   : > { %v802_v27 = vpop.f32.mrb[8].mxu0 }
 0x25a   : > { %v803_v28 = vadd.f32 %v802_v27, %v714_v19  ;;  %v3285_v29 = vpop.f32.mrb[9].mxu0 }
 0x25b   : > { %v805_v31 = vpop.f32.mrb[10].mxu0 }
 0x25c   : > { %v912_v32 = vadd.f32 %v906_v23, %v803_v28  ;;  %v3286_v33 = vpop.f32.mrb[11].mxu0  ;;  %v2949_v23 = vld [vmem:[%s4613_s9] ss:$0 sm:$0xff] }
 0x25e   : > { %v920_v34 = vadd.f32 %v2924_v30, %v912_v32 }
 0x260   : > { %v921_v35 = vmul.f32 %v920_v34, %v920_v34 }
 0x262   : > { %v922_v36 = vmul.f32 %v921_v35, %v920_v34 }
 0x264   : > { %v923_v37 = vmul.f32 0.044715, %v922_v36 }
 0x266   : > { %v924_v38 = vadd.f32 %v923_v37, %v920_v34 }
 0x268   : > { %v925_v40 = vmul.f32 0.7978846, %v924_v38 }
 0x26a   : > { %3872 = vtanh.f32 %v925_v40  ;;  %v3781_v40 = vld [vmem:[#allocation2 + $0x140] sm:$0xff]  }
 0x274   : > { %v3873_v41 = vpop.eup %3872 }
 0x275   : > { %v927_v42 = vadd.f32 1.0, %v3873_v41 }
 0x277   : > { %v928_v43 = vmul.f32 0.5, %v927_v42 }
 0x279   : > { %v929_v44 = vmul.f32 %v928_v43, %v920_v34 }
 0x27b   : > { %v930_v46 = vpack.c.bf16 %v929_v44, %v929_v44  ;;  %v931_v47 = vrot.slane %v929_v44, 7  ;;  %v934_v57 = vrot.slane %v929_v44, 1  ;;  %v3783_v44 = vld [vmem:[#allocation2 + $0x148] sm:$0xff]  }
 0x27d   : > { %3324 = vmatmul.mubr.bf16.vlgmr.msra.gmra.mrb[12].mxu0 %v930_v46  ;;  %v932_v48 = vmul.f32 %v931_v47, %v4348_v62  ;;  %v935_v59 = vmul.f32 %v934_v57, %v4335_v49  ;;  %v3767_v62 = vld [vmem:[#allocation2 + $0x108] sm:$0xff]   ;;  %v3784_v46 = vld [vmem:[#allocation2 + $0x150] sm:$0xff]   ;;  %v3785_v47 = vld [vmem:[#allocation2 + $0x158] sm:$0xff]  }
 0x27e   : > { %3348 = vmatpush3.bf16.msra.mxu0 %v3757_v45  ;;  %3363 = vmatprep.mubr.msk.bf16.mxu0 %vm4044_vm0, %v4043_v0  ;;  %v3770_v49 = vld [vmem:[#allocation2 + $0xc8] sm:$0xff]   ;;  %v3790_v57 = vld [vmem:[#allocation5 + $0x100] sm:$0xff]  }
 0x27f   : > { %3349 = vmatprep.subr.bf16.mxu0 %v4043_v0  ;;  %v933_v51 = vpack.c.bf16 %v932_v48, %v932_v48  ;;  %v936_v60 = vpack.c.bf16 %v935_v59, %v935_v59  ;;  %v3786_v48 = vld [vmem:[#allocation2 + $0x160] sm:$0xff]  }
 0x280   : > { %v3792_v59 = vld [vmem:[#allocation5 + $0xc0] sm:$0xff]  }
 0x281   : > { %3344 = vmatmul.mubr.bf16.vlgmr.msra.gmra.mrb[4].mxu1 %v933_v51  ;;  %v3788_v51 = vld [vmem:[#allocation2 + $0x170] sm:$0xff]  }
 0x282   : > { %3350 = vmatpush3.bf16.msra.mxu0 %v3759_v50  ;;  %3383 = vmatprep.mubr.msk.bf16.mxu1 %vm4044_vm0, %v4043_v0  ;;  %v3787_v50 = vld [vmem:[#allocation2 + $0x168] sm:$0xff]  }
 0x283   : > { %3351 = vmatprep.subr.bf16.mxu0 %v4043_v0  ;;  %3368 = vmatpush3.bf16.msra.mxu1 %v3766_v61  ;;  %v3794_v61 = vld [vmem:[#allocation5 + $0xc8] sm:$0xff]  }
 0x284   : > { %3369 = vmatprep.subr.bf16.mxu1 %v4043_v0 }
 0x286   : > { %3352 = vmatpush3.bf16.msra.mxu0 %v3760_v52 }
 0x287   : > { %3353 = vmatprep.subr.bf16.mxu0 %v4043_v0  ;;  %3370 = vmatpush3.bf16.msra.mxu1 %v3767_v62  ;;  %v3795_v62 = vld [vmem:[#allocation5 + $0x118] sm:$0xff]  }
 0x288   : > { %3371 = vmatprep.subr.bf16.mxu1 %v4043_v0 }
 0x28a   : > { %3354 = vmatpush3.bf16.msra.mxu0 %v3761_v53  ;;  %v4430_v53 = vpop.permute.xlu0 %1280 }
 0x28b   : > { %3355 = vmatprep.subr.bf16.mxu0 %v4043_v0  ;;  %3372 = vmatpush3.bf16.msra.mxu1 %v3769_v1  ;;  %v3797_v1 = vld [vmem:[#allocation5 + $0x120] sm:$0xff]  }
 0x28c   : > { %3373 = vmatprep.subr.bf16.mxu1 %v4043_v0 }
 0x28e   : > { %3356 = vmatpush3.bf16.msra.mxu0 %v3762_v54  ;;  %v3789_v54 = vld [vmem:[#allocation2 + $0x178] sm:$0xff]  }
 0x28f   : > { %3357 = vmatprep.subr.bf16.mxu0 %v4043_v0  ;;  %3374 = vmatpush3.bf16.msra.mxu1 %v3771_v2  ;;  %v3799_v2 = vld [vmem:[#allocation5 + $0x128] sm:$0xff]  }
 0x290   : > { %3375 = vmatprep.subr.bf16.mxu1 %v4043_v0 }
 0x292   : > { %3358 = vmatpush3.bf16.msra.mxu0 %v3763_v55 }
 0x293   : > { %3359 = vmatprep.subr.bf16.mxu0 %v4043_v0  ;;  %3376 = vmatpush3.bf16.msra.mxu1 %v3773_v4  ;;  %v3801_v4 = vld [vmem:[#allocation5 + $0x130] sm:$0xff]  }
 0x294   : > { %3377 = vmatprep.subr.bf16.mxu1 %v4043_v0 }
 0x296   : > { %3360 = vmatpush3.bf16.msra.mxu0 %v3764_v56 }
 0x297   : > { %3361 = vmatprep.subr.bf16.mxu0 %v4043_v0  ;;  %3378 = vmatpush3.bf16.msra.mxu1 %v3775_v6  ;;  %v3803_v6 = vld [vmem:[#allocation5 + $0x138] sm:$0xff]  }
 0x298   : > { %3379 = vmatprep.subr.bf16.mxu1 %v4043_v0 }
 0x29a   : > { %3362 = vmatpush3.bf16.msra.mxu0 %v3765_v58  ;;  %v3791_v58 = vld [vmem:[#allocation5 + $0x108] sm:$0xff]  }
 0x29b   : > { %3387 = vmatprep.subr.bf16.mxu0 %v4043_v0  ;;  %3380 = vmatpush3.bf16.msra.mxu1 %v3777_v8  ;;  %v3806_v8 = vld [vmem:[#allocation5 + $0xf8] sm:$0xff]  }
 0x29c   : > { %3381 = vmatprep.subr.bf16.mxu1 %v4043_v0 }
 0x29d   : > { %3364 = vmatmul.mubr.bf16.vlgmr.msra.gmra.mrb[16].mxu0 %v936_v60  ;;  %v3793_v60 = vld [vmem:[#allocation5 + $0x110] sm:$0xff]  }
 0x29e   : > { %3403 = vmatprep.mubr.msk.bf16.mxu0 %vm4044_vm0, %v4043_v0  ;;  %3388 = vmatpush3.bf16.msra.mxu0 %v3768_v63  ;;  %v3796_v63 = vld [vmem:[#allocation5 + $0xd0] sm:$0xff]  }
 0x29f   : > { %3389 = vmatprep.subr.bf16.mxu0 %v4043_v0  ;;  %3382 = vmatpush3.bf16.msra.mxu1 %v3779_v10 }
 0x2a0   : > { %3407 = vmatprep.subr.bf16.mxu1 %v4043_v0 }
 0x2a2   : > { %3390 = vmatpush3.bf16.msra.mxu0 %v3770_v49  ;;  %v3798_v49 = vld [vmem:[#allocation5 + $0xd8] sm:$0xff]  }
 0x2a3   : > { %3391 = vmatprep.subr.bf16.mxu0 %v4043_v0 }
 0x2a6   : > { %3392 = vmatpush3.bf16.msra.mxu0 %v3772_v3  ;;  %v3800_v3 = vld [vmem:[#allocation5 + $0xe0] sm:$0xff]  }
 0x2a7   : > { %3393 = vmatprep.subr.bf16.mxu0 %v4043_v0 }
 0x2aa   : > { %3394 = vmatpush3.bf16.msra.mxu0 %v3774_v5  ;;  %v3802_v5 = vld [vmem:[#allocation5 + $0xe8] sm:$0xff]  }
 0x2ab   : > { %3395 = vmatprep.subr.bf16.mxu0 %v4043_v0 }
 0x2ae   : > { %3396 = vmatpush3.bf16.msra.mxu0 %v3776_v7  ;;  %v3804_v7 = vld [vmem:[#allocation5 + $0xf0] sm:$0xff]  }
 0x2af   : > { %3397 = vmatprep.subr.bf16.mxu0 %v4043_v0 }
 0x2b2   : > { %3398 = vmatpush3.bf16.msra.mxu0 %v3778_v9 }
 0x2b3   : > { %3399 = vmatprep.subr.bf16.mxu0 %v4043_v0 }
 0x2b6   : > { %3400 = vmatpush3.bf16.msra.mxu0 %v3780_v11 }
 0x2b7   : > { %3401 = vmatprep.subr.bf16.mxu0 %v4043_v0 }
 0x2ba   : > { %3402 = vmatpush3.bf16.msra.mxu0 %v3782_v12 }
 0x2bb   : > { %3427 = vmatprep.subr.bf16.mxu0 %v4043_v0 }
 0x350   : > { %v1051_v13 = vpop.f32.mrb[12].mxu0 }
 0x351   : > { %v3325_v14 = vpop.f32.mrb[13].mxu0 }
 0x352   : > { %v1054_v15 = vpop.f32.mrb[14].mxu0 }
 0x353   : > { %v3326_v16 = vpop.f32.mrb[15].mxu0 }
 0x354   : > { %v1139_v17 = vpop.f32.mrb[4].mxu1 }
 0x355   : > { %v1140_v18 = vadd.f32 %v1139_v17, %v1051_v13  ;;  %v3345_v19 = vpop.f32.mrb[5].mxu1 }
 0x356   : > { %v1142_v20 = vpop.f32.mrb[6].mxu1  ;;  %v2975_v19 = vld [vmem:[%s4611_s7 + $0x1] ss:$0 sm:$0xff] }
 0x357   : > { %v3346_v21 = vpop.f32.mrb[7].mxu1 }
 0x370   : > { %v1243_v22 = vpop.f32.mrb[16].mxu0 }
 0x371   : > { %v1249_v24 = vadd.f32 %v1243_v22, %v1140_v18  ;;  %v3365_v25 = vpop.f32.mrb[17].mxu0 }
 0x372   : > { %v1246_v26 = vpop.f32.mrb[18].mxu0 }
 0x373   : > { %v1257_v27 = vadd.f32 %v2949_v23, %v1249_v24  ;;  %v3366_v28 = vpop.f32.mrb[19].mxu0 }
 0x375   : > { %v4410_v29 = vadd.f32 %v1257_v27, %v4328_v39  ;;  %v4417_v39 = vpop.permute.xlu1 %1272 }
 0x377   : > { %v1259_v30 = vmul.f32 %v4410_v29, %v4410_v29 }
 0x379   : > { %v1260_v31 = vmul.f32 %v1259_v30, %v4410_v29 }
 0x37b   : > { %v1261_v32 = vmul.f32 0.044715, %v1260_v31 }
 0x37d   : > { %v1262_v33 = vadd.f32 %v1261_v32, %v4410_v29 }
 0x37f   : > { %v1263_v34 = vmul.f32 0.7978846, %v1262_v33 }
 0x381   : > { %3874 = vtanh.f32 %v1263_v34 }
 0x38b   : > { %v3875_v35 = vpop.eup %3874 }
 0x38c   : > { %v1265_v36 = vadd.f32 1.0, %v3875_v35  ;;  %v3805_v35 = vld [vmem:[#allocation5 + $0x140] sm:$0xff]  }
 0x38e   : > { %v1266_v37 = vmul.f32 0.5, %v1265_v36 }
 0x390   : > { %v1267_v38 = vmul.f32 %v1266_v37, %v4410_v29 }
 0x392   : > { %v1268_v41 = vpack.c.bf16 %v1267_v38, %v1267_v38  ;;  %v1269_v42 = vrot.slane %v1267_v38, 6  ;;  %v1277_v52 = vrot.slane %v1267_v38, 2 }
 0x394   : > { %3384 = vmatmul.mubr.bf16.vlgmr.msra.gmra.mrb[8].mxu1 %v1268_v41  ;;  %v1275_v43 = vmul.f32 %v4417_v39, %v1269_v42  ;;  %v1283_v55 = vmul.f32 %v4430_v53, %v1277_v52  ;;  %v3808_v42 = vld [vmem:[#allocation5 + $0x150] sm:$0xff]   ;;  %v3815_v52 = vld [vmem:[#allocation7 + $0x88] sm:$0xff]  }
 0x395   : > { %3408 = vmatpush3.bf16.msra.mxu1 %v3781_v40  ;;  %3423 = vmatprep.mubr.msk.bf16.mxu1 %vm4044_vm0, %v4043_v0  ;;  %v3807_v40 = vld [vmem:[#allocation5 + $0x148] sm:$0xff]  }
 0x396   : > { %3409 = vmatprep.subr.bf16.mxu1 %v4043_v0  ;;  %v1276_v45 = vpack.c.bf16 %v1275_v43, %v1275_v43  ;;  %v1284_v56 = vpack.c.bf16 %v1283_v55, %v1283_v55  ;;  %v3809_v43 = vld [vmem:[#allocation5 + $0x158] sm:$0xff]  }
 0x397   : > { %v3817_v55 = vld [vmem:[#allocation7 + $0x98] sm:$0xff]  }
 0x398   : > { %3404 = vmatmul.mubr.bf16.vlgmr.msra.gmra.mrb[20].mxu0 %v1276_v45  ;;  %v3812_v45 = vld [vmem:[#allocation5 + $0x170] sm:$0xff]  }
 0x399   : > { %3410 = vmatpush3.bf16.msra.mxu1 %v3783_v44  ;;  %3443 = vmatprep.mubr.msk.bf16.mxu0 %vm4044_vm0, %v4043_v0  ;;  %v3811_v44 = vld [vmem:[#allocation5 + $0x168] sm:$0xff]  }
 0x39a   : > { %3411 = vmatprep.subr.bf16.mxu1 %v4043_v0  ;;  %3428 = vmatpush3.bf16.msra.mxu0 %v3790_v57  ;;  %v3820_v57 = vld [vmem:[#allocation7 + $0xb0] sm:$0xff]  }
 0x39b   : > { %3429 = vmatprep.subr.bf16.mxu0 %v4043_v0 }
 0x39d   : > { %3412 = vmatpush3.bf16.msra.mxu1 %v3784_v46 }
 0x39e   : > { %3413 = vmatprep.subr.bf16.mxu1 %v4043_v0  ;;  %3430 = vmatpush3.bf16.msra.mxu0 %v3791_v58  ;;  %v3821_v58 = vld [vmem:[#allocation2 + $0x1c0] sm:$0xff]  }
 0x39f   : > { %3431 = vmatprep.subr.bf16.mxu0 %v4043_v0 }
 0x3a1   : > { %3414 = vmatpush3.bf16.msra.mxu1 %v3785_v47  ;;  %v3813_v47 = vld [vmem:[#allocation5 + $0x178] sm:$0xff]  }
 0x3a2   : > { %3415 = vmatprep.subr.bf16.mxu1 %v4043_v0  ;;  %3432 = vmatpush3.bf16.msra.mxu0 %v3793_v60  ;;  %v3823_v60 = vld [vmem:[#allocation2 + $0x1c8] sm:$0xff]  }
 0x3a3   : > { %3433 = vmatprep.subr.bf16.mxu0 %v4043_v0 }
 0x3a5   : > { %3416 = vmatpush3.bf16.msra.mxu1 %v3786_v48 }
 0x3a6   : > { %3417 = vmatprep.subr.bf16.mxu1 %v4043_v0  ;;  %3434 = vmatpush3.bf16.msra.mxu0 %v3795_v62  ;;  %v3827_v62 = vld [vmem:[#allocation2 + $0x1d8] sm:$0xff]  }
 0x3a7   : > { %3435 = vmatprep.subr.bf16.mxu0 %v4043_v0 }
 0x3a9   : > { %3418 = vmatpush3.bf16.msra.mxu1 %v3787_v50 }
 0x3aa   : > { %3419 = vmatprep.subr.bf16.mxu1 %v4043_v0  ;;  %3436 = vmatpush3.bf16.msra.mxu0 %v3797_v1  ;;  %v3831_v1 = vld [vmem:[#allocation2 + $0x1e8] sm:$0xff]  }
 0x3ab   : > { %3437 = vmatprep.subr.bf16.mxu0 %v4043_v0 }
 0x3ad   : > { %3420 = vmatpush3.bf16.msra.mxu1 %v3788_v51  ;;  %v3814_v51 = vld [vmem:[#allocation7 + $0x80] sm:$0xff]  }
 0x3ae   : > { %3421 = vmatprep.subr.bf16.mxu1 %v4043_v0  ;;  %3438 = vmatpush3.bf16.msra.mxu0 %v3799_v2  ;;  %v3835_v2 = vld [vmem:[#allocation2 + $0x1f8] sm:$0xff]  }
 0x3af   : > { %3439 = vmatprep.subr.bf16.mxu0 %v4043_v0 }
 0x3b1   : > { %3422 = vmatpush3.bf16.msra.mxu1 %v3789_v54  ;;  %v3816_v54 = vld [vmem:[#allocation7 + $0x90] sm:$0xff]  }
 0x3b2   : > { %3447 = vmatprep.subr.bf16.mxu1 %v4043_v0  ;;  %3440 = vmatpush3.bf16.msra.mxu0 %v3801_v4 }
 0x3b3   : > { %3441 = vmatprep.subr.bf16.mxu0 %v4043_v0 }
 0x3b4   : > { %3424 = vmatmul.mubr.bf16.vlgmr.msra.gmra.mrb[12].mxu1 %v1284_v56  ;;  %v3819_v56 = vld [vmem:[#allocation7 + $0xa8] sm:$0xff]  }
 0x3b5   : > { %3463 = vmatprep.mubr.msk.bf16.mxu1 %vm4044_vm0, %v4043_v0  ;;  %3448 = vmatpush3.bf16.msra.mxu1 %v3792_v59  ;;  %v3822_v59 = vld [vmem:[#allocation7 + $0xb8] sm:$0xff]  }
 0x3b6   : > { %3449 = vmatprep.subr.bf16.mxu1 %v4043_v0  ;;  %3442 = vmatpush3.bf16.msra.mxu0 %v3803_v6 }
 0x3b7   : > { %3467 = vmatprep.subr.bf16.mxu0 %v4043_v0 }
 0x3b9   : > { %3450 = vmatpush3.bf16.msra.mxu1 %v3794_v61  ;;  %v3825_v61 = vld [vmem:[#allocation2 + $0x1d0] sm:$0xff]  }
 0x3ba   : > { %3451 = vmatprep.subr.bf16.mxu1 %v4043_v0 }
 0x3bd   : > { %3452 = vmatpush3.bf16.msra.mxu1 %v3796_v63  ;;  %v3829_v63 = vld [vmem:[#allocation2 + $0x1e0] sm:$0xff]  }
 0x3be   : > { %3453 = vmatprep.subr.bf16.mxu1 %v4043_v0 }
 0x3c1   : > { %3454 = vmatpush3.bf16.msra.mxu1 %v3798_v49  ;;  %v3833_v49 = vld [vmem:[#allocation2 + $0x1f0] sm:$0xff]  }
 0x3c2   : > { %3455 = vmatprep.subr.bf16.mxu1 %v4043_v0 }
 0x3c5   : > { %3456 = vmatpush3.bf16.msra.mxu1 %v3800_v3 }
 0x3c6   : > { %3457 = vmatprep.subr.bf16.mxu1 %v4043_v0 }
 0x3c9   : > { %3458 = vmatpush3.bf16.msra.mxu1 %v3802_v5 }
 0x3ca   : > { %3459 = vmatprep.subr.bf16.mxu1 %v4043_v0 }
 0x3cd   : > { %3460 = vmatpush3.bf16.msra.mxu1 %v3804_v7 }
 0x3ce   : > { %3461 = vmatprep.subr.bf16.mxu1 %v4043_v0 }
 0x3d1   : > { %3462 = vmatpush3.bf16.msra.mxu1 %v3806_v8 }
 0x3d2   : > { %3487 = vmatprep.subr.bf16.mxu1 %v4043_v0 }
 0x467   : > { %v1400_v9 = vpop.f32.mrb[8].mxu1 }
 0x468   : > { %v3385_v10 = vpop.f32.mrb[9].mxu1 }
 0x469   : > { %v1403_v11 = vpop.f32.mrb[10].mxu1 }
 0x46a   : > { %v3386_v12 = vpop.f32.mrb[11].mxu1 }
 0x46b   : > { %v1488_v13 = vpop.f32.mrb[20].mxu0 }
 0x46c   : > { %v1489_v14 = vadd.f32 %v1488_v13, %v1400_v9  ;;  %v3405_v15 = vpop.f32.mrb[21].mxu0  ;;  %v3001_v13 = vld [vmem:[%s4613_s9 + $0x1] ss:$0 sm:$0xff] }
 0x46d   : > { %v1491_v16 = vpop.f32.mrb[22].mxu0 }
 0x46e   : > { %v3406_v17 = vpop.f32.mrb[23].mxu0 }
 0x487   : > { %v1592_v18 = vpop.f32.mrb[12].mxu1 }
 0x488   : > { %v1598_v20 = vadd.f32 %v1592_v18, %v1489_v14  ;;  %v3425_v21 = vpop.f32.mrb[13].mxu1 }
 0x489   : > { %v1595_v22 = vpop.f32.mrb[14].mxu1 }
 0x48a   : > { %v1607_v23 = vadd.f32 %v2975_v19, %v1598_v20  ;;  %v3426_v24 = vpop.f32.mrb[15].mxu1  ;;  %v3824_v20 = vld [vmem:[#allocation2 + $0x180] sm:$0xff]  }
 0x48b   : > { %v3826_v24 = vld [vmem:[#allocation2 + $0x188] sm:$0xff]  }
 0x48c   : > { %v1608_v25 = vmul.f32 %v1607_v23, %v1607_v23 }
 0x48e   : > { %v1609_v26 = vmul.f32 %v1608_v25, %v1607_v23 }
 0x490   : > { %v1610_v27 = vmul.f32 0.044715, %v1609_v26 }
 0x492   : > { %v1611_v28 = vadd.f32 %v1610_v27, %v1607_v23  ;;  %v3828_v27 = vld [vmem:[#allocation2 + $0x190] sm:$0xff]  }
 0x494   : > { %v1612_v30 = vmul.f32 0.7978846, %v1611_v28 }
 0x496   : > { %3876 = vtanh.f32 %v1612_v30  ;;  %v3832_v30 = vld [vmem:[#allocation2 + $0x1a0] sm:$0xff]  }
 0x4a0   : > { %v3877_v31 = vpop.eup %3876 }
 0x4a1   : > { %v1614_v32 = vadd.f32 1.0, %v3877_v31  ;;  %v3834_v31 = vld [vmem:[#allocation2 + $0x1a8] sm:$0xff]  }
 0x4a3   : > { %v1615_v33 = vmul.f32 0.5, %v1614_v32 }
 0x4a5   : > { %v1616_v34 = vmul.f32 %v1615_v33, %v1607_v23 }
 0x4a7   : > { %v1617_v36 = vpack.c.bf16 %v1616_v34, %v1616_v34  ;;  %v1618_v37 = vrot.slane %v1616_v34, 6  ;;  %v1621_v46 = vrot.slane %v1616_v34, 2  ;;  %v3836_v34 = vld [vmem:[#allocation2 + $0x1b0] sm:$0xff]  }
 0x4a9   : > { %3444 = vmatmul.mubr.bf16.vlgmr.msra.gmra.mrb[24].mxu0 %v1617_v36  ;;  %v1619_v38 = vmul.f32 %v1618_v37, %v4417_v39  ;;  %v3810_v39 = vld [vmem:[#allocation5 + $0x160] sm:$0xff]   ;;  %v1622_v48 = vmul.f32 %v1621_v46, %v4430_v53  ;;  %v3841_v46 = vld [vmem:[#allocation2 + $0x218] sm:$0xff]  }
 0x4aa   : > { %3468 = vmatpush3.bf16.msra.mxu0 %v3805_v35  ;;  %3483 = vmatprep.mubr.msk.bf16.mxu0 %vm4044_vm0, %v4043_v0  ;;  %v3818_v53 = vld [vmem:[#allocation7 + $0xa0] sm:$0xff]  }
 0x4ab   : > { %3469 = vmatprep.subr.bf16.mxu0 %v4043_v0  ;;  %v1620_v41 = vpack.c.bf16 %v1619_v38, %v1619_v38  ;;  %v1623_v50 = vpack.c.bf16 %v1622_v48, %v1622_v48  ;;  %v3837_v37 = vld [vmem:[#allocation2 + $0x200] sm:$0xff]   ;;  %v3843_v48 = vld [vmem:[#allocation2 + $0x228] sm:$0xff]  }
 0x4ad   : > { %3464 = vmatmul.mubr.bf16.vlgmr.msra.gmra.mrb[16].mxu1 %v1620_v41 }
 0x4ae   : > { %3470 = vmatpush3.bf16.msra.mxu0 %v3807_v40  ;;  %3503 = vmatprep.mubr.msk.bf16.mxu1 %vm4044_vm0, %v4043_v0  ;;  %v3838_v40 = vld [vmem:[#allocation2 + $0x1b8] sm:$0xff]  }
 0x4af   : > { %3471 = vmatprep.subr.bf16.mxu0 %v4043_v0  ;;  %3488 = vmatpush3.bf16.msra.mxu1 %v3814_v51  ;;  %v4515_v51 = vpop.permute.xlu0 %2082 }
 0x4b0   : > { %3489 = vmatprep.subr.bf16.mxu1 %v4043_v0 }
 0x4b2   : > { %3472 = vmatpush3.bf16.msra.mxu0 %v3808_v42  ;;  %v4500_v42 = vpop.permute.xlu1 %2075 }
 0x4b3   : > { %3473 = vmatprep.subr.bf16.mxu0 %v4043_v0  ;;  %3490 = vmatpush3.bf16.msra.mxu1 %v3815_v52  ;;  %v3845_v52 = vld [vmem:[#allocation2 + $0x238] sm:$0xff]  }
 0x4b4   : > { %3491 = vmatprep.subr.bf16.mxu1 %v4043_v0 }
 0x4b6   : > { %3474 = vmatpush3.bf16.msra.mxu0 %v3809_v43 }
 0x4b7   : > { %3475 = vmatprep.subr.bf16.mxu0 %v4043_v0  ;;  %3492 = vmatpush3.bf16.msra.mxu1 %v3816_v54 }
 0x4b8   : > { %3493 = vmatprep.subr.bf16.mxu1 %v4043_v0 }
 0x4ba   : > { %3476 = vmatpush3.bf16.msra.mxu0 %v3810_v39  ;;  %v3839_v39 = vld [vmem:[#allocation2 + $0x208] sm:$0xff]  }
 0x4bb   : > { %3477 = vmatprep.subr.bf16.mxu0 %v4043_v0  ;;  %3494 = vmatpush3.bf16.msra.mxu1 %v3817_v55 }
 0x4bc   : > { %3495 = vmatprep.subr.bf16.mxu1 %v4043_v0 }
 0x4be   : > { %3478 = vmatpush3.bf16.msra.mxu0 %v3811_v44 }
 0x4bf   : > { %3479 = vmatprep.subr.bf16.mxu0 %v4043_v0  ;;  %3496 = vmatpush3.bf16.msra.mxu1 %v3818_v53  ;;  %v3846_v53 = vld [vmem:[#allocation5 + $0x1c0] sm:$0xff]  }
 0x4c0   : > { %3497 = vmatprep.subr.bf16.mxu1 %v4043_v0 }
 0x4c2   : > { %3480 = vmatpush3.bf16.msra.mxu0 %v3812_v45  ;;  %v3840_v45 = vld [vmem:[#allocation2 + $0x210] sm:$0xff]  }
 0x4c3   : > { %3481 = vmatprep.subr.bf16.mxu0 %v4043_v0  ;;  %3498 = vmatpush3.bf16.msra.mxu1 %v3819_v56  ;;  %v3847_v56 = vld [vmem:[#allocation5 + $0x1c8] sm:$0xff]  }
 0x4c4   : > { %3499 = vmatprep.subr.bf16.mxu1 %v4043_v0 }
 0x4c6   : > { %3482 = vmatpush3.bf16.msra.mxu0 %v3813_v47  ;;  %v3842_v47 = vld [vmem:[#allocation2 + $0x220] sm:$0xff]  }
 0x4c7   : > { %3507 = vmatprep.subr.bf16.mxu0 %v4043_v0  ;;  %3500 = vmatpush3.bf16.msra.mxu1 %v3820_v57  ;;  %v3848_v57 = vld [vmem:[#allocation5 + $0x1d0] sm:$0xff]  }
 0x4c8   : > { %3501 = vmatprep.subr.bf16.mxu1 %v4043_v0 }
 0x4c9   : > { %3484 = vmatmul.mubr.bf16.vlgmr.msra.gmra.mrb[28].mxu0 %v1623_v50  ;;  %v3844_v50 = vld [vmem:[#allocation2 + $0x230] sm:$0xff]  }
 0x4ca   : > { %3523 = vmatprep.mubr.msk.bf16.mxu0 %vm4044_vm0, %v4043_v0  ;;  %3508 = vmatpush3.bf16.msra.mxu0 %v3821_v58  ;;  %v3849_v58 = vld [vmem:[#allocation5 + $0x1d8] sm:$0xff]  }
 0x4cb   : > { %3502 = vmatpush3.bf16.msra.mxu1 %v3822_v59  ;;  %3509 = vmatprep.subr.bf16.mxu0 %v4043_v0  ;;  %v3850_v59 = vld [vmem:[#allocation5 + $0x1e0] sm:$0xff]  }
 0x4cc   : > { %3527 = vmatprep.subr.bf16.mxu1 %v4043_v0 }
 0x4ce   : > { %3510 = vmatpush3.bf16.msra.mxu0 %v3823_v60  ;;  %v3851_v60 = vld [vmem:[#allocation5 + $0x1e8] sm:$0xff]  }
 0x4cf   : > { %3511 = vmatprep.subr.bf16.mxu0 %v4043_v0 }
 0x4d2   : > { %3512 = vmatpush3.bf16.msra.mxu0 %v3825_v61  ;;  %v3852_v61 = vld [vmem:[#allocation5 + $0x1f0] sm:$0xff]  }
 0x4d3   : > { %3513 = vmatprep.subr.bf16.mxu0 %v4043_v0 }
 0x4d6   : > { %3514 = vmatpush3.bf16.msra.mxu0 %v3827_v62  ;;  %v3853_v62 = vld [vmem:[#allocation5 + $0x1f8] sm:$0xff]  }
 0x4d7   : > { %3515 = vmatprep.subr.bf16.mxu0 %v4043_v0 }
 0x4da   : > { %3516 = vmatpush3.bf16.msra.mxu0 %v3829_v63 }
 0x4db   : > { %3517 = vmatprep.subr.bf16.mxu0 %v4043_v0 }
 0x4de   : > { %3518 = vmatpush3.bf16.msra.mxu0 %v3831_v1 }
 0x4df   : > { %3519 = vmatprep.subr.bf16.mxu0 %v4043_v0 }
 0x4e2   : > { %3520 = vmatpush3.bf16.msra.mxu0 %v3833_v49 }
 0x4e3   : > { %3521 = vmatprep.subr.bf16.mxu0 %v4043_v0 }
 0x4e6   : > { %3522 = vmatpush3.bf16.msra.mxu0 %v3835_v2 }
 0x4e7   : > { %3547 = vmatprep.subr.bf16.mxu0 %v4043_v0 }
 0x57c   : > { %v1739_v3 = vpop.f32.mrb[24].mxu0 }
 0x57d   : > { %v3445_v4 = vpop.f32.mrb[25].mxu0 }
 0x57e   : > { %v1742_v5 = vpop.f32.mrb[26].mxu0 }
 0x57f   : > { %v3446_v6 = vpop.f32.mrb[27].mxu0 }
 0x580   : > { %v1827_v7 = vpop.f32.mrb[16].mxu1 }
 0x581   : > { %v1828_v8 = vadd.f32 %v1827_v7, %v1739_v3  ;;  %v3465_v9 = vpop.f32.mrb[17].mxu1 }
 0x582   : > { %v1830_v10 = vpop.f32.mrb[18].mxu1  ;;  %v3037_v9 = vld [vmem:[%s4611_s7 + $0x2] ss:$0 sm:$0xff] }
 0x583   : > { %v3466_v11 = vpop.f32.mrb[19].mxu1 }
 0x59c   : > { %v1931_v12 = vpop.f32.mrb[28].mxu0 }
 0x59d   : > { %v1937_v14 = vadd.f32 %v1931_v12, %v1828_v8  ;;  %v3485_v15 = vpop.f32.mrb[29].mxu0 }
 0x59e   : > { %v1934_v16 = vpop.f32.mrb[30].mxu0 }
 0x59f   : > { %v1946_v17 = vadd.f32 %v3001_v13, %v1937_v14  ;;  %v3486_v18 = vpop.f32.mrb[31].mxu0 }
 0x5a1   : > { %v1947_v19 = vadd.f32 %v1946_v17, %v4410_v29  ;;  %v3830_v29 = vld [vmem:[#allocation2 + $0x198] sm:$0xff]  }
 0x5a3   : > { %v2062_v21 = vmul.f32 %v1947_v19, %v1947_v19  ;;  %v1948_v22 = vpack.c.bf16 %v1947_v19, %v1947_v19 }
 0x5a5   : > { %v2063_v23 = vmul.f32 %v2062_v21, %v1947_v19  ;;  %3504 = vmatmul.mubr.bf16.vlgmr.msra.gmra.mrb[20].mxu1 %v1948_v22 }
 0x5a6   : > { %3528 = vmatpush3.bf16.msra.mxu1 %v3824_v20  ;;  %3543 = vmatprep.mubr.msk.bf16.mxu1 %vm4044_vm0, %v4043_v0 }
 0x5a7   : > { %v2064_v25 = vmul.f32 0.044715, %v2063_v23  ;;  %3529 = vmatprep.subr.bf16.mxu1 %v4043_v0 }
 0x5a9   : > { %v2065_v26 = vadd.f32 %v2064_v25, %v1947_v19 }
 0x5aa   : > { %3530 = vmatpush3.bf16.msra.mxu1 %v3826_v24  ;;  %v3854_v24 = vld [vmem:[#allocation5 + $0x180] sm:$0xff]  }
 0x5ab   : > { %3531 = vmatprep.subr.bf16.mxu1 %v4043_v0  ;;  %v2066_v28 = vmul.f32 0.7978846, %v2065_v26  ;;  %v3855_v26 = vld [vmem:[#allocation5 + $0x188] sm:$0xff]  }
 0x5ad   : > { %3878 = vtanh.f32 %v2066_v28  ;;  %v3857_v28 = vld [vmem:[#allocation5 + $0x198] sm:$0xff]  }
 0x5ae   : > { %3532 = vmatpush3.bf16.msra.mxu1 %v3828_v27  ;;  %v3856_v27 = vld [vmem:[#allocation5 + $0x190] sm:$0xff]  }
 0x5af   : > { %3533 = vmatprep.subr.bf16.mxu1 %v4043_v0 }
 0x5b2   : > { %3534 = vmatpush3.bf16.msra.mxu1 %v3830_v29  ;;  %v3858_v29 = vld [vmem:[#allocation5 + $0x1a0] sm:$0xff]  }
 0x5b3   : > { %3535 = vmatprep.subr.bf16.mxu1 %v4043_v0 }
 0x5b6   : > { %3536 = vmatpush3.bf16.msra.mxu1 %v3832_v30  ;;  %v3859_v30 = vld [vmem:[#allocation5 + $0x1a8] sm:$0xff]  }
 0x5b7   : > { %v3879_v32 = vpop.eup %3878  ;;  %3537 = vmatprep.subr.bf16.mxu1 %v4043_v0 }
 0x5b8   : > { %v2068_v33 = vadd.f32 1.0, %v3879_v32 }
 0x5ba   : > { %3538 = vmatpush3.bf16.msra.mxu1 %v3834_v31  ;;  %v2069_v35 = vmul.f32 0.5, %v2068_v33  ;;  %v3860_v31 = vld [vmem:[#allocation5 + $0x1b0] sm:$0xff]   ;;  %v3861_v33 = vld [vmem:[#allocation5 + $0x1b8] sm:$0xff]  }
 0x5bb   : > { %3539 = vmatprep.subr.bf16.mxu1 %v4043_v0 }
 0x5bc   : > { %v2070_v36 = vmul.f32 %v2069_v35, %v1947_v19  ;;  %v3862_v35 = vld [vmem:[#allocation5 + $0x200] sm:$0xff]  }
 0x5be   : > { %3540 = vmatpush3.bf16.msra.mxu1 %v3836_v34  ;;  %v2071_v38 = vpack.c.bf16 %v2070_v36, %v2070_v36  ;;  %v2072_v41 = vrot.slane %v2070_v36, 4 }
 0x5bf   : > { %3541 = vmatprep.subr.bf16.mxu1 %v4043_v0 }
 0x5c0   : > { %3524 = vmatmul.mubr.bf16.vlgmr.msra.gmra.mrb[32].mxu0 %v2071_v38  ;;  %v2078_v43 = vmul.f32 %v4500_v42, %v2072_v41  ;;  %v2085_v54 = vmul.f32 %v4515_v51, %v2072_v41  ;;  %v3864_v38 = vld [vmem:[#allocation5 + $0x210] sm:$0xff]   ;;  %v3866_v41 = vld [vmem:[#allocation5 + $0x220] sm:$0xff]  }
 0x5c1   : > { %3548 = vmatpush3.bf16.msra.mxu0 %v3837_v37  ;;  %3563 = vmatprep.mubr.msk.bf16.mxu0 %vm4044_vm0, %v4043_v0  ;;  %v3863_v37 = vld [vmem:[#allocation5 + $0x208] sm:$0xff]  }
 0x5c2   : > { %3542 = vmatpush3.bf16.msra.mxu1 %v3838_v40  ;;  %3549 = vmatprep.subr.bf16.mxu0 %v4043_v0  ;;  %v2079_v44 = vpack.c.bf16 %v2078_v43, %v2078_v43  ;;  %v2086_v55 = vpack.c.bf16 %v2085_v54, %v2085_v54  ;;  %v3865_v40 = vld [vmem:[#allocation5 + $0x218] sm:$0xff]   ;;  %v3868_v43 = vld [vmem:[#allocation5 + $0x230] sm:$0xff]  }
 0x5c3   : > { %3567 = vmatprep.subr.bf16.mxu1 %v4043_v0 }
 0x5c5   : > { %3544 = vmatmul.mubr.bf16.vlgmr.msra.gmra.mrb[24].mxu1 %v2079_v44  ;;  %3550 = vmatpush3.bf16.msra.mxu0 %v3839_v39  ;;  %v3869_v39 = vld [vmem:[#allocation5 + $0x238] sm:$0xff]  }
 0x5c6   : > { %3551 = vmatprep.subr.bf16.mxu0 %v4043_v0  ;;  %3583 = vmatprep.mubr.msk.bf16.mxu1 %vm4044_vm0, %v4043_v0 }
 0x5c7   : > { %3568 = vmatpush3.bf16.msra.mxu1 %v3846_v53 }
 0x5c8   : > { %3569 = vmatprep.subr.bf16.mxu1 %v4043_v0 }
 0x5c9   : > { %3552 = vmatpush3.bf16.msra.mxu0 %v3840_v45 }
 0x5ca   : > { %3553 = vmatprep.subr.bf16.mxu0 %v4043_v0 }
 0x5cb   : > { %3570 = vmatpush3.bf16.msra.mxu1 %v3847_v56 }
 0x5cc   : > { %3571 = vmatprep.subr.bf16.mxu1 %v4043_v0 }
 0x5cd   : > { %3554 = vmatpush3.bf16.msra.mxu0 %v3841_v46  ;;  %v3003_v46 = vld [vmem:[%s4615_s11 + $0x2] ss:$0 sm:$0xff] }
 0x5ce   : > { %3555 = vmatprep.subr.bf16.mxu0 %v4043_v0 }
 0x5cf   : > { %3572 = vmatpush3.bf16.msra.mxu1 %v3848_v57 }
 0x5d0   : > { %3573 = vmatprep.subr.bf16.mxu1 %v4043_v0 }
 0x5d1   : > { %3556 = vmatpush3.bf16.msra.mxu0 %v3842_v47 }
 0x5d2   : > { %3557 = vmatprep.subr.bf16.mxu0 %v4043_v0 }
 0x5d3   : > { %3574 = vmatpush3.bf16.msra.mxu1 %v3849_v58 }
 0x5d4   : > { %3575 = vmatprep.subr.bf16.mxu1 %v4043_v0 }
 0x5d5   : > { %3558 = vmatpush3.bf16.msra.mxu0 %v3843_v48  ;;  %v3063_v48 = vld [vmem:[%s4613_s9 + $0x2] ss:$0 sm:$0xff] }
 0x5d6   : > { %3559 = vmatprep.subr.bf16.mxu0 %v4043_v0 }
 0x5d7   : > { %3576 = vmatpush3.bf16.msra.mxu1 %v3850_v59 }
 0x5d8   : > { %3577 = vmatprep.subr.bf16.mxu1 %v4043_v0 }
 0x5d9   : > { %3560 = vmatpush3.bf16.msra.mxu0 %v3844_v50 }
 0x5da   : > { %3561 = vmatprep.subr.bf16.mxu0 %v4043_v0 }
 0x5db   : > { %3578 = vmatpush3.bf16.msra.mxu1 %v3851_v60 }
 0x5dc   : > { %3579 = vmatprep.subr.bf16.mxu1 %v4043_v0 }
 0x5dd   : > { %3562 = vmatpush3.bf16.msra.mxu0 %v3845_v52 }
 0x5df   : > { %3580 = vmatpush3.bf16.msra.mxu1 %v3852_v61 }
 0x5e0   : > { %3564 = vmatmul.mubr.bf16.vlgmr.msra.gmra.mrb[36].mxu0 %v2086_v55  ;;  %3581 = vmatprep.subr.bf16.mxu1 %v4043_v0 }
 0x5e3   : > { %3582 = vmatpush3.bf16.msra.mxu1 %v3853_v62 }
 0x5e4   : > { %3587 = vmatprep.subr.bf16.mxu1 %v4043_v0 }
 0x693   : > { %v2202_v63 = vpop.f32.mrb[32].mxu0 }
 0x694   : > { %v3525_v1 = vpop.f32.mrb[33].mxu0 }
 0x695   : > { %v2205_v49 = vpop.f32.mrb[34].mxu0 }
 0x696   : > { %v3526_v2 = vpop.f32.mrb[35].mxu0 }
 0x698   : > { %v2290_v3 = vpop.f32.mrb[24].mxu1 }
 0x699   : > { %v2291_v4 = vadd.f32 %v2290_v3, %v2202_v63  ;;  %v3545_v5 = vpop.f32.mrb[25].mxu1 }
 0x69a   : > { %v2293_v6 = vpop.f32.mrb[26].mxu1 }
 0x69b   : > { %v3546_v7 = vpop.f32.mrb[27].mxu1 }
 0x6b3   : > { %v2394_v8 = vpop.f32.mrb[36].mxu0 }
 0x6b4   : > { %v2400_v10 = vadd.f32 %v2394_v8, %v2291_v4  ;;  %v3565_v11 = vpop.f32.mrb[37].mxu0 }
 0x6b5   : > { %v2397_v12 = vpop.f32.mrb[38].mxu0 }
 0x6b6   : > { %v2409_v13 = vadd.f32 %v3037_v9, %v2400_v10  ;;  %v3566_v14 = vpop.f32.mrb[39].mxu0 }
 0x6b8   : > { %v2410_v15 = vmul.f32 %v2409_v13, %v2409_v13 }
 0x6ba   : > { %v2411_v16 = vmul.f32 %v2410_v15, %v2409_v13 }
 0x6bc   : > { %v2412_v17 = vmul.f32 0.044715, %v2411_v16 }
 0x6be   : > { %v2413_v18 = vadd.f32 %v2412_v17, %v2409_v13 }
 0x6c0   : > { %v2414_v19 = vmul.f32 0.7978846, %v2413_v18 }
 0x6c2   : > { %3880 = vtanh.f32 %v2414_v19 }
 0x6cc   : > { %v3881_v20 = vpop.eup %3880 }
 0x6cd   : > { %v2416_v21 = vadd.f32 1.0, %v3881_v20 }
 0x6cf   : > { %v2417_v22 = vmul.f32 0.5, %v2416_v21 }
 0x6d1   : > { %v2418_v23 = vmul.f32 %v2417_v22, %v2409_v13 }
 0x6d3   : > { %v2419_v25 = vpack.c.bf16 %v2418_v23, %v2418_v23  ;;  %v2420_v32 = vrot.slane %v2418_v23, 4 }
 0x6d5   : > { %3584 = vmatmul.mubr.bf16.vlgmr.msra.gmra.mrb[20].mxu1 %v2419_v25  ;;  %v2421_v34 = vmul.f32 %v2420_v32, %v4500_v42  ;;  %v3867_v42 = vld [vmem:[#allocation5 + $0x228] sm:$0xff]   ;;  %v2423_v44 = vmul.f32 %v2420_v32, %v4515_v51 }
 0x6d6   : > { %3588 = vmatpush3.bf16.msra.mxu1 %v3854_v24  ;;  %3603 = vmatprep.mubr.msk.bf16.mxu1 %vm4044_vm0, %v4043_v0 }
 0x6d7   : > { %3589 = vmatprep.subr.bf16.mxu1 %v4043_v0  ;;  %v2422_v36 = vpack.c.bf16 %v2421_v34, %v2421_v34  ;;  %v2424_v45 = vpack.c.bf16 %v2423_v44, %v2423_v44 }
 0x6da   : > { %3590 = vmatpush3.bf16.msra.mxu1 %v3855_v26 }
 0x6db   : > { %3591 = vmatprep.subr.bf16.mxu1 %v4043_v0 }
 0x6de   : > { %3592 = vmatpush3.bf16.msra.mxu1 %v3856_v27 }
 0x6df   : > { %3593 = vmatprep.subr.bf16.mxu1 %v4043_v0 }
 0x6e2   : > { %3594 = vmatpush3.bf16.msra.mxu1 %v3857_v28 }
 0x6e3   : > { %3595 = vmatprep.subr.bf16.mxu1 %v4043_v0 }
 0x6e6   : > { %3596 = vmatpush3.bf16.msra.mxu1 %v3858_v29 }
 0x6e7   : > { %3597 = vmatprep.subr.bf16.mxu1 %v4043_v0 }
 0x6ea   : > { %3598 = vmatpush3.bf16.msra.mxu1 %v3859_v30 }
 0x6eb   : > { %3599 = vmatprep.subr.bf16.mxu1 %v4043_v0 }
 0x6ee   : > { %3600 = vmatpush3.bf16.msra.mxu1 %v3860_v31 }
 0x6ef   : > { %3601 = vmatprep.subr.bf16.mxu1 %v4043_v0 }
 0x6f2   : > { %3602 = vmatpush3.bf16.msra.mxu1 %v3861_v33 }
 0x6f3   : > { %3607 = vmatprep.subr.bf16.mxu1 %v4043_v0 }
 0x6f5   : > { %3604 = vmatmul.mubr.bf16.vlgmr.msra.gmra.mrb[20].mxu1 %v2422_v36 }
 0x6f6   : > { %3608 = vmatpush3.bf16.msra.mxu1 %v3862_v35  ;;  %3623 = vmatprep.mubr.msk.bf16.mxu1 %vm4044_vm0, %v4043_v0 }
 0x6f7   : > { %3609 = vmatprep.subr.bf16.mxu1 %v4043_v0 }
 0x6fa   : > { %3610 = vmatpush3.bf16.msra.mxu1 %v3863_v37 }
 0x6fb   : > { %3611 = vmatprep.subr.bf16.mxu1 %v4043_v0 }
 0x6fe   : > { %3612 = vmatpush3.bf16.msra.mxu1 %v3864_v38 }
 0x6ff   : > { %3613 = vmatprep.subr.bf16.mxu1 %v4043_v0 }
 0x702   : > { %3614 = vmatpush3.bf16.msra.mxu1 %v3865_v40 }
 0x703   : > { %3615 = vmatprep.subr.bf16.mxu1 %v4043_v0 }
 0x706   : > { %3616 = vmatpush3.bf16.msra.mxu1 %v3866_v41 }
 0x707   : > { %3617 = vmatprep.subr.bf16.mxu1 %v4043_v0 }
 0x70a   : > { %3618 = vmatpush3.bf16.msra.mxu1 %v3867_v42 }
 0x70b   : > { %3619 = vmatprep.subr.bf16.mxu1 %v4043_v0 }
 0x70e   : > { %3620 = vmatpush3.bf16.msra.mxu1 %v3868_v43 }
 0x70f   : > { %3621 = vmatprep.subr.bf16.mxu1 %v4043_v0 }
 0x712   : > { %3622 = vmatpush3.bf16.msra.mxu1 %v3869_v39 }
 0x715   : > { %3624 = vmatmul.mubr.bf16.vlgmr.msra.gmra.mrb[20].mxu1 %v2424_v45 }
 0x7e8   : > { %v2732_v47 = vpop.f32.mrb[20].mxu1 }
 0x7e9   : > { %v3627_v0 = vadd.f32 %v3003_v46, %v2732_v47  ;;  %v3625_v50 = vpop.f32.mrb[21].mxu1 }
 0x7ea   : > { %v2735_v51 = vpop.f32.mrb[22].mxu1 }
 0x7eb   : > { %v3628_v52 = vadd.f32 %v3627_v0, %v3063_v48  ;;  %v3626_v54 = vpop.f32.mrb[23].mxu1 }
 0x7ed   : > { %2749 = vst [vmem:[%s474_s15] sm:$0xff] %v3628_v52 }
 0x7ee   : > { %3979 = shalt.err (!%p3976_p9)
}
 0x7ef   : > { %s3980_s19 = scalar_lea.hbm %s4562_s24, 128  ;;  %s3984_s12 = scalar_lea.hbm %s4649_s13, 256 }
 0x7f0   : > { %p3981_p2 = scmp.ne.s32.totalorder %s4562_s24, %s3980_s19  ;;  %p3985_p5 = scmp.lt.u32.totalorder %s4562_s24, %s4649_s13 }
 0x7f1   : > { %p3986_p10 = scmp.lt.u32.totalorder %s3984_s12, %s3980_s19  ;;  %p3988_p12 = scmp.lt.u32.totalorder %s3980_s19, %s4562_s24 }
 0x7f2   : > { %p3982_p0 = pnand %p3981_p2, %p4650_p7 }
 0x7f3   : > { %p3987_p4 = por %p3986_p10, %p3985_p5 }
 0x7f4   : > { %p3983_p3 = pneg %p3982_p0 }
 0x7f5   : > { %p3989_p8 = por %p3988_p12, %p3987_p4 }
 0x7f7   : > { %p3990_p11 = pnand %p3989_p8, %p3983_p3 }
 0x7f9   : > { %3993 = shalt.err (!%p3990_p11)
}
 0x7fa   : > { %3653 = dma.vmem_to_hbm [thread:$0]  (%p4650_p7), %s4564_s28, 128, %s4562_s24, %s2751_s29  }
 0x7fb PF: > { %s4651_s30 = sld [smem:[#allocation14_spill]]  ;;  %s4652_s23 = sld [smem:[#allocation12_spill]] }
 0x7fc   : > { %s4653_s21 = sld [smem:[#allocation18_spill]] }
 0x801   : > { %p3675_p13 = scmp.ge.s32.totalorder %s4651_s30, 2  ;;  %s2776_s25 = sand.u32 1, %s4652_s23  }
 0x802   : > { %p4654_p1 = scmp.ne.s32.totalorder %s4653_s21, 0  ;;  %s2777_s16 = scalar_lea.sflag [#allocation4], %s2776_s25 }
 0x804   : > { %p3666_p6 = pnand %p3675_p13, %p4654_p1 }
 0x806   : > { %4019 = dma.done.wait (!%p3666_p6), %s2777_s16, 128  }
 0x807   : > { %4021 = vsyncadd (!%p3666_p6), %s2777_s16, 4294967168  ;;  %s4655_s24 = sld [smem:[#allocation15_spill]]  ;;  %s4656_s26 = sld [smem:[#allocation13_spill]] }
 0x808   : > { %s4657_s23 = sld [smem:[#allocation16_spill]]  ;;  %s4658_s21 = smov %s4028_s22 }
 0x80d   : > { %p24_p9 = scmp.ge.s32.totalorder %s4655_s24, 4   ;;  %s4659_s22 = smov %s4656_s26 }
 0x80f   :  { %26 = sbr.rel (!%p24_p9) target bundleno = 7 (0x7), region = 132 }
 0x816   :  { %2782 = vsyncpa [#allocation3], 1 }
 0x817   :  { %2784 = vsyncpa [#allocation3 + $0x1], 1 }
 0x818   :  { %2785 = vsyncpa [#allocation6], 1 }
 0x819   :  { %2786 = vsyncpa [#allocation4], 1 }
 0x81a   :  { %2788 = vsyncpa [#allocation4 + $0x1], 1 }

</bundles_post_ra>
